<compile_context>
chip_gen: v5e
topology: v5e:2x2
jax: 0.10.0
libtpu: 0.0.40
codegen_flags: <defaults>
</compile_context>

<pallas_src>
import functools

import jax
import jax.numpy as jnp
from jax import lax
from jax.experimental import pallas as pl
from jax.experimental.pallas import tpu as pltpu


# --------------------------------------------------------------------------- #
# Tiling helper
# --------------------------------------------------------------------------- #
def _choose_tile_h(ho, wo, target_rows):
    """Largest divisor of `ho` whose output tile (tile_h*wo rows) is sublane-legal
    and no bigger than ~target_rows MXU rows. Falls back to the whole image."""
    if ho * wo <= max(target_rows, 8):
        return ho
    fallback = ho
    for d in range(ho - 1, 0, -1):
        if ho % d != 0 or (d * wo) % 8 != 0:
            continue
        if d * wo <= max(target_rows, 8):
            return d
        fallback = d  # smallest sublane-legal divisor seen so far (VMEM-bounded)
    return fallback


# --------------------------------------------------------------------------- #
# Pallas kernel 1: fused im2col conv for one (batch, output-row-tile) grid point
# --------------------------------------------------------------------------- #
def _conv_kernel(x_ref, w_ref, b_ref, o_ref, *, KH, KW, stride, tile_h, Wo, Hq):
    """
    x_ref : (1, stride*stride*Hq, Wq, Cin)  phase-decomposed reflection-padded input
    w_ref : (KH*KW*Cin, Cout_pad)           fused, lane-dense weight matrix
    b_ref : (1, Cout_pad)                   f32 bias
    o_ref : (1, tile_h*Wo, Cout_pad)        lane-dense output tile (flat rows)
    """
    t = pl.program_id(1)
    row0 = t * tile_h
    if tile_h % 8 == 0:
        row0 = pl.multiple_of(row0, 8)

    # Build the im2col patch tensor with unit-stride ref slices only: padded input
    # row oh*s + kh lives in phase (kh % s) at decimated row oh + kh // s.
    taps = []
    for kh in range(KH):
        for kw in range(KW):
            phase = (kh % stride) * stride + (kw % stride)
            r_off = phase * Hq + kh // stride
            c_off = kw // stride
            taps.append(
                x_ref[0, pl.ds(row0 + r_off, tile_h), pl.ds(c_off, Wo), :])
    patches = jnp.concatenate(taps, axis=-1)            # (tile_h, Wo, KH*KW*Cin)
    patches = patches.reshape(tile_h * Wo, patches.shape[-1])

    # Single MXU matmul (M = tile_h*Wo, K = KH*KW*Cin, N = Cout_pad), f32 accumulate.
    acc = jnp.dot(patches, w_ref[...], preferred_element_type=jnp.float32)
    acc = acc + b_ref[...]                              # f32 bias add (VPU)
    o_ref[0] = acc.astype(o_ref.dtype)


# --------------------------------------------------------------------------- #
# NHWC conv wrapper: ReflectionPad2d(k//2) + Conv2d(in, out, k, stride)
# --------------------------------------------------------------------------- #
def conv_nhwc(x, weight, bias, *, kernel_size, stride=1, compute_dtype=None,
              target_rows=256):
    """x: (N, H, W, Cin); weight: (Cout, Cin, K, K); bias: (Cout,).
    Returns (N, Ho, Wo, Cout) NHWC. compute_dtype=jnp.bfloat16 enables the bf16
    MXU path (f32 accumulation)."""
    N, H, W, Cin = x.shape
    Cout = weight.shape[0]
    KH = KW = int(kernel_size)
    s = int(stride)
    pad = KH // 2

    out_dtype = x.dtype
    cdt = jnp.dtype(compute_dtype) if compute_dtype is not None else jnp.dtype(out_dtype)

    # Reflection pad (matches nn.ReflectionPad2d(k//2)).
    x_pad = jnp.pad(x, ((0, 0), (pad, pad), (pad, pad), (0, 0)), mode="reflect")
    Hp, Wp = H + 2 * pad, W + 2 * pad
    Ho = (Hp - KH) // s + 1
    Wo = (Wp - KW) // s + 1

    # Phase decomposition (skipped entirely for stride 1): element [phase, r, c]
    # of the decomposed input is padded pixel (r*s + ph, c*s + pw). All in-kernel
    # tap reads become unit-stride slices.
    if s == 1:
        Hq, Wq = Hp, Wp
        x_ph = x_pad.astype(cdt)
    else:
        Hq = -(-Hp // s)
        Wq = -(-Wp // s)
        x_ph = jnp.pad(x_pad, ((0, 0), (0, Hq * s - Hp), (0, Wq * s - Wp), (0, 0)))
        x_ph = x_ph.reshape(N, Hq, s, Wq, s, Cin).transpose(0, 2, 4, 1, 3, 5)
        x_ph = x_ph.reshape(N, s * s * Hq, Wq, Cin).astype(cdt)

    # Fused, lane-dense weights: (Cout, Cin, KH, KW) -> (KH*KW*Cin, Cout_pad).
    Cout_pad = ((Cout + 127) // 128) * 128
    w2 = jnp.transpose(weight, (2, 3, 1, 0)).reshape(KH * KW * Cin, Cout)
    w2 = jnp.pad(w2, ((0, 0), (0, Cout_pad - Cout))).astype(cdt)
    b2 = jnp.pad(bias.astype(jnp.float32), (0, Cout_pad - Cout)).reshape(1, Cout_pad)

    tile_h = _choose_tile_h(Ho, Wo, target_rows)
    T = Ho // tile_h
    assert Ho % tile_h == 0

    kernel = functools.partial(_conv_kernel, KH=KH, KW=KW, stride=s,
                               tile_h=tile_h, Wo=Wo, Hq=Hq)

    itemsize_c = jnp.dtype(cdt).itemsize
    itemsize_o = jnp.dtype(out_dtype).itemsize
    flops = 2 * N * Ho * Wo * KH * KW * Cin * Cout_pad
    bytes_accessed = (x_ph.size * itemsize_c + w2.size * itemsize_c
                      + b2.size * 4 + N * Ho * Wo * Cout_pad * itemsize_o)
    cost = pl.CostEstimate(flops=int(flops), transcendentals=0,
                           bytes_accessed=int(bytes_accessed))

    # Explicit VMEM budget (capped at v7x's 64 MiB physical VMEM).
    x_blk = s * s * Hq * Wq * Cin * itemsize_c
    o_blk = tile_h * Wo * Cout_pad * itemsize_o
    w_blk = w2.size * itemsize_c + Cout_pad * 4
    vmem_limit = int(min(60 * 2**20,
                         max(32 * 2**20, 2 * (x_blk + o_blk + w_blk) + (8 << 20))))

    out_flat = pl.pallas_call(
        kernel,
        out_shape=jax.ShapeDtypeStruct((N, Ho * Wo, Cout_pad), out_dtype),
        grid_spec=pltpu.PrefetchScalarGridSpec(
            num_scalar_prefetch=0,
            grid=(N, T),
            in_specs=[
                pl.BlockSpec((1, s * s * Hq, Wq, Cin), lambda n, t: (n, 0, 0, 0)),
                pl.BlockSpec((KH * KW * Cin, Cout_pad), lambda n, t: (0, 0)),
                pl.BlockSpec((1, Cout_pad), lambda n, t: (0, 0)),
            ],
            out_specs=pl.BlockSpec((1, tile_h * Wo, Cout_pad), lambda n, t: (n, t, 0)),
        ),
        compiler_params=pltpu.CompilerParams(
            dimension_semantics=("parallel", "parallel"),
            vmem_limit_bytes=vmem_limit),
        cost_estimate=cost,
    )(x_ph, w2, b2)

    return out_flat[:, :, :Cout].reshape(N, Ho, Wo, Cout)


def custom_convolutional_layer(x_nchw, weight, bias, *, kernel_size, stride=1,
                               compute_dtype=None, target_rows=256):
    """NCHW-interface wrapper matching the PyTorch CustomConvolutionalLayer."""
    x = jnp.transpose(x_nchw, (0, 2, 3, 1))
    y = conv_nhwc(x, weight, bias, kernel_size=kernel_size, stride=stride,
                  compute_dtype=compute_dtype, target_rows=target_rows)
    return jnp.transpose(y, (0, 3, 1, 2))


# --------------------------------------------------------------------------- #
# Pallas kernel 2: fused InstanceNorm (+affine) (+residual add) (+ReLU), NHWC
# --------------------------------------------------------------------------- #
def _instance_norm_kernel(*refs, eps, relu, residual):
    if residual:
        x_ref, r_ref, g_ref, b_ref, o_ref = refs
    else:
        x_ref, g_ref, b_ref, o_ref = refs
    x = x_ref[0].astype(jnp.float32)                         # (HW, C)
    mean = jnp.mean(x, axis=0, keepdims=True)                # (1, C) cross-sublane
    xc = x - mean
    var = jnp.mean(xc * xc, axis=0, keepdims=True)
    y = xc * lax.rsqrt(var + eps)
    y = y * g_ref[...] + b_ref[...]
    if residual:
        y = y + r_ref[0].astype(jnp.float32)
    if relu:
        y = jnp.maximum(y, 0.0)
    o_ref[0] = y.astype(o_ref.dtype)


def instance_norm_nhwc(x, gamma, beta, *, eps=1e-5, relu=False, residual=None):
    """Fused InstanceNorm2d(affine=True) [+ residual add] [+ ReLU] in NHWC."""
    N, H, W, C = x.shape
    HW = H * W
    xf = x.reshape(N, HW, C)

    inputs = [xf]
    in_specs = [pl.BlockSpec((1, HW, C), lambda n: (n, 0, 0))]
    if residual is not None:
        inputs.append(residual.reshape(N, HW, C))
        in_specs.append(pl.BlockSpec((1, HW, C), lambda n: (n, 0, 0)))
    inputs.append(gamma.astype(jnp.float32).reshape(1, C))
    inputs.append(beta.astype(jnp.float32).reshape(1, C))
    in_specs.append(pl.BlockSpec((1, C), lambda n: (0, 0)))
    in_specs.append(pl.BlockSpec((1, C), lambda n: (0, 0)))

    kernel = functools.partial(_instance_norm_kernel, eps=eps, relu=relu,
                               residual=residual is not None)
    out = pl.pallas_call(
        kernel,
        out_shape=jax.ShapeDtypeStruct((N, HW, C), x.dtype),
        grid_spec=pltpu.PrefetchScalarGridSpec(
            num_scalar_prefetch=0,
            grid=(N,),
            in_specs=in_specs,
            out_specs=pl.BlockSpec((1, HW, C), lambda n: (n, 0, 0)),
        ),
        compiler_params=pltpu.CompilerParams(dimension_semantics=("parallel",)),
    )(*inputs)
    return out.reshape(N, H, W, C)


# --------------------------------------------------------------------------- #
# Plain-JAX glue + references
# --------------------------------------------------------------------------- #
def _upsample_nearest_nhwc(x, factor):
    return jnp.repeat(jnp.repeat(x, factor, axis=1), factor, axis=2)


def _instance_norm_nchw(x, gamma, beta, eps=1e-5):
    mean = jnp.mean(x, axis=(2, 3), keepdims=True)
    var = jnp.var(x, axis=(2, 3), keepdims=True)
    xn = (x - mean) * lax.rsqrt(var + eps)
    return xn * gamma[None, :, None, None] + beta[None, :, None, None]


def _reference_conv(x, weight, bias, kernel_size, stride):
    pad = kernel_size // 2
    xp = jnp.pad(x, ((0, 0), (0, 0), (pad, pad), (pad, pad)), mode="reflect")
    out = lax.conv_general_dilated(
        xp, weight, window_strides=(stride, stride), padding="VALID",
        dimension_numbers=("NCHW", "OIHW", "NCHW"))
    return out + bias[None, :, None, None]


# --------------------------------------------------------------------------- #
# DeepStyleX forward (NHWC internally; NCHW at the model boundary)
# --------------------------------------------------------------------------- #
def build_deepstylex(key, downsample_layers, num_residual_blocks, upsample_layers,
                     compute_dtype=None):
    downsample_layers = [l if isinstance(l, (list, tuple)) else (l,) for l in downsample_layers]
    upsample_layers = [l if isinstance(l, (list, tuple)) else (l,) for l in upsample_layers]
    assert downsample_layers[-1][0] == upsample_layers[0][0]

    def conv_init(k, cin, cout, ksz):
        k1, k2 = jax.random.split(k)
        w = jax.random.normal(k1, (cout, cin, ksz, ksz), jnp.float32) / float((cin * ksz * ksz) ** 0.5)
        b = jax.random.normal(k2, (cout,), jnp.float32) * 0.01
        return w, b

    def norm_init(c):
        return jnp.ones((c,), jnp.float32), jnp.zeros((c,), jnp.float32)

    keys = iter(jax.random.split(key, 64))

    down = []
    for i in range(1, len(downsample_layers)):
        cin, cout = downsample_layers[i - 1][0], downsample_layers[i][0]
        ksz, stride = downsample_layers[i - 1][1], downsample_layers[i - 1][2]
        w, b = conv_init(next(keys), cin, cout, ksz)
        g, bt = norm_init(cout)
        down.append((w, b, ksz, stride, g, bt))

    ch = upsample_layers[0][0]
    res = []
    for _ in range(num_residual_blocks):
        w1, b1 = conv_init(next(keys), ch, ch, 3)
        g1, bt1 = norm_init(ch)
        w2, b2 = conv_init(next(keys), ch, ch, 3)
        g2, bt2 = norm_init(ch)
        res.append((w1, b1, g1, bt1, w2, b2, g2, bt2))

    up = []
    for i in range(1, len(upsample_layers)):
        cin, cout = upsample_layers[i - 1][0], upsample_layers[i][0]
        ksz = upsample_layers[i - 1][1]
        if i < len(upsample_layers) - 1:
            factor = upsample_layers[i - 1][2]
            w, b = conv_init(next(keys), cin, cout, ksz)
            g, bt = norm_init(cout)
            up.append(("upconv", w, b, ksz, factor, g, bt))
        else:
            w, b = conv_init(next(keys), cin, cout, ksz)
            up.append(("conv", w, b, ksz))

    conv = functools.partial(conv_nhwc, compute_dtype=compute_dtype)

    def forward(x_nchw):
        y = jnp.transpose(x_nchw, (0, 2, 3, 1))              # NHWC for the whole net
        for (w, b, ksz, stride, g, bt) in down:
            y = conv(y, w, b, kernel_size=ksz, stride=stride)
            y = instance_norm_nhwc(y, g, bt, relu=True)
        for (w1, b1, g1, bt1, w2, b2, g2, bt2) in res:
            r = conv(y, w1, b1, kernel_size=3, stride=1)
            r = instance_norm_nhwc(r, g1, bt1, relu=True)
            r = conv(r, w2, b2, kernel_size=3, stride=1)
            y = instance_norm_nhwc(r, g2, bt2, relu=False, residual=y)
        for layer in up:
            if layer[0] == "upconv":
                _, w, b, ksz, factor, g, bt = layer
                y = _upsample_nearest_nhwc(y, factor)
                y = conv(y, w, b, kernel_size=ksz, stride=1)
                y = instance_norm_nhwc(y, g, bt, relu=True)
            else:
                _, w, b, ksz = layer
                y = conv(y, w, b, kernel_size=ksz, stride=1)
        return jnp.transpose(y, (0, 3, 1, 2))                # back to NCHW

    def forward_ref(x_nchw):
        y = x_nchw
        for (w, b, ksz, stride, g, bt) in down:
            y = jnp.maximum(_instance_norm_nchw(_reference_conv(y, w, b, ksz, stride), g, bt), 0.0)
        for (w1, b1, g1, bt1, w2, b2, g2, bt2) in res:
            r = jnp.maximum(_instance_norm_nchw(_reference_conv(y, w1, b1, 3, 1), g1, bt1), 0.0)
            r = _instance_norm_nchw(_reference_conv(r, w2, b2, 3, 1), g2, bt2)
            y = r + y
        for layer in up:
            if layer[0] == "upconv":
                _, w, b, ksz, factor, g, bt = layer
                y = jnp.repeat(jnp.repeat(y, factor, axis=2), factor, axis=3)
                y = jnp.maximum(_instance_norm_nchw(_reference_conv(y, w, b, ksz, 1), g, bt), 0.0)
            else:
                _, w, b, ksz = layer
                y = _reference_conv(y, w, b, ksz, 1)
        return y

    return forward, forward_ref


# --------------------------------------------------------------------------- #
# Tests
# --------------------------------------------------------------------------- #
if __name__ == "__main__":
    key = jax.random.PRNGKey(0)
    kx, kw_, kb_, kin, kg, kbeta, kmodel, kimg = jax.random.split(key, 8)

    # ---- Test 1: CustomConvolutionalLayer, k=3, stride=1, f32 ---------------
    N, Cin, H, W = 2, 4, 16, 16
    Cout, K = 8, 3
    x = jax.random.normal(kx, (N, Cin, H, W), jnp.float32)
    weight = jax.random.normal(kw_, (Cout, Cin, K, K), jnp.float32) * 0.1
    bias = jax.random.normal(kb_, (Cout,), jnp.float32) * 0.1

    out = jax.block_until_ready(
        custom_convolutional_layer(x, weight, bias, kernel_size=K, stride=1))
    ref = _reference_conv(x, weight, bias, K, 1)
    assert out.shape == ref.shape, (out.shape, ref.shape)
    assert jnp.allclose(out, ref, atol=5e-4, rtol=5e-4), float(jnp.max(jnp.abs(out - ref)))

    # ---- Test 2: strided conv (k=3, stride=2), f32 --------------------------
    out2 = jax.block_until_ready(
        custom_convolutional_layer(x, weight, bias, kernel_size=K, stride=2))
    ref2 = _reference_conv(x, weight, bias, K, 2)
    assert out2.shape == ref2.shape, (out2.shape, ref2.shape)
    assert jnp.allclose(out2, ref2, atol=5e-4, rtol=5e-4), float(jnp.max(jnp.abs(out2 - ref2)))

    # ---- Test 3: bf16 compute path (v6e/v7x), loose tolerance ---------------
    out3 = jax.block_until_ready(
        custom_convolutional_layer(x, weight, bias, kernel_size=K, stride=1,
                                   compute_dtype=jnp.bfloat16))
    assert jnp.allclose(out3, ref, atol=5e-2, rtol=5e-2), float(jnp.max(jnp.abs(out3 - ref)))

    # ---- Test 4: fused InstanceNorm+ReLU kernel vs plain JAX ----------------
    xin = jax.random.normal(kin, (2, 8, 8, 16), jnp.float32)
    g = 1.0 + 0.1 * jax.random.normal(kg, (16,), jnp.float32)
    bt = 0.1 * jax.random.normal(kbeta, (16,), jnp.float32)
    out4 = jax.block_until_ready(instance_norm_nhwc(xin, g, bt, relu=True))
    mean = jnp.mean(xin, axis=(1, 2), keepdims=True)
    var = jnp.var(xin, axis=(1, 2), keepdims=True)
    ref4 = jnp.maximum((xin - mean) * lax.rsqrt(var + 1e-5) * g + bt, 0.0)
    assert jnp.allclose(out4, ref4, atol=1e-4, rtol=1e-4), float(jnp.max(jnp.abs(out4 - ref4)))

    # ---- Test 5: full DeepStyleX forward vs plain-JAX reference -------------
    fwd, fwd_ref = build_deepstylex(
        kmodel,
        downsample_layers=[(3, 9, 1), (8, 3, 2), (16, 3, 2), (32,)],
        num_residual_blocks=2,
        upsample_layers=[(32, 3, 2), (16, 3, 2), (8, 9, 2), (3,)])
    img = jax.random.normal(kimg, (1, 3, 16, 16), jnp.float32)
    y = jax.block_until_ready(jax.jit(fwd)(img))
    y_ref = jax.block_until_ready(jax.jit(fwd_ref)(img))
    assert y.shape == (1, 3, 16, 16), y.shape
    assert bool(jnp.all(jnp.isfinite(y)))
    assert jnp.allclose(y, y_ref, atol=2e-2, rtol=2e-2), float(jnp.max(jnp.abs(y - y_ref)))

    print("KERNEL_OK")
</pallas_src>

<mosaic_0001>
module attributes {stable_mosaic.version = 11 : i64} {
  func.func @_conv_kernel(%arg0: i32, %arg1: i32, %arg2: memref<1x18x18x4xf32, #tpu.memory_space<vmem>>, %arg3: memref<36x128xf32, #tpu.memory_space<vmem>>, %arg4: memref<1x128xf32, #tpu.memory_space<vmem>>, %arg5: memref<1x256x128xf32, #tpu.memory_space<vmem>>) attributes {dimension_semantics = [#tpu.dimension_semantics<parallel>, #tpu.dimension_semantics<parallel>], iteration_bounds = array<i64: 2, 1>, scalar_prefetch = 0 : i64, scratch_operands = 0 : i64, tpu.core_type = #tpu.core_type<tc>, window_params = [{transform_indices = @transform_0, window_bounds = array<i64: 1, 18, 18, 4>}, {pipeline_mode = #tpu.pipeline_mode<synchronous>, transform_indices = @transform_1, window_bounds = array<i64: 36, 128>}, {pipeline_mode = #tpu.pipeline_mode<synchronous>, transform_indices = @transform_2, window_bounds = array<i64: 1, 128>}, {transform_indices = @transform_3, window_bounds = array<i64: 1, 256, 128>}]} {
    %c16_i32 = arith.constant 16 : i32
    %0 = arith.muli %arg1, %c16_i32 : i32
    %1 = tpu.assume_multiple %0, 8 : i32
    %c0_i32 = arith.constant 0 : i32
    %2 = arith.addi %1, %c0_i32 : i32
    %c0 = arith.constant 0 : index
    %3 = arith.index_cast %2 : i32 to index
    %c0_0 = arith.constant 0 : index
    %c0_1 = arith.constant 0 : index
    %4 = vector.load %arg2[%c0, %3, %c0_0, %c0_1] : memref<1x18x18x4xf32, #tpu.memory_space<vmem>>, vector<1x16x16x4xf32>
    %5 = vector.shape_cast %4 : vector<1x16x16x4xf32> to vector<16x16x4xf32>
    %c0_i32_2 = arith.constant 0 : i32
    %6 = arith.addi %1, %c0_i32_2 : i32
    %c0_3 = arith.constant 0 : index
    %7 = arith.index_cast %6 : i32 to index
    %c1 = arith.constant 1 : index
    %c0_4 = arith.constant 0 : index
    %8 = vector.load %arg2[%c0_3, %7, %c1, %c0_4] : memref<1x18x18x4xf32, #tpu.memory_space<vmem>>, vector<1x16x16x4xf32>
    %9 = vector.shape_cast %8 : vector<1x16x16x4xf32> to vector<16x16x4xf32>
    %c0_i32_5 = arith.constant 0 : i32
    %10 = arith.addi %1, %c0_i32_5 : i32
    %c0_6 = arith.constant 0 : index
    %11 = arith.index_cast %10 : i32 to index
    %c2 = arith.constant 2 : index
    %c0_7 = arith.constant 0 : index
    %12 = vector.load %arg2[%c0_6, %11, %c2, %c0_7] : memref<1x18x18x4xf32, #tpu.memory_space<vmem>>, vector<1x16x16x4xf32>
    %13 = vector.shape_cast %12 : vector<1x16x16x4xf32> to vector<16x16x4xf32>
    %c1_i32 = arith.constant 1 : i32
    %14 = arith.addi %1, %c1_i32 : i32
    %c0_8 = arith.constant 0 : index
    %15 = arith.index_cast %14 : i32 to index
    %c0_9 = arith.constant 0 : index
    %c0_10 = arith.constant 0 : index
    %16 = vector.load %arg2[%c0_8, %15, %c0_9, %c0_10] : memref<1x18x18x4xf32, #tpu.memory_space<vmem>>, vector<1x16x16x4xf32>
    %17 = vector.shape_cast %16 : vector<1x16x16x4xf32> to vector<16x16x4xf32>
    %c1_i32_11 = arith.constant 1 : i32
    %18 = arith.addi %1, %c1_i32_11 : i32
    %c0_12 = arith.constant 0 : index
    %19 = arith.index_cast %18 : i32 to index
    %c1_13 = arith.constant 1 : index
    %c0_14 = arith.constant 0 : index
    %20 = vector.load %arg2[%c0_12, %19, %c1_13, %c0_14] : memref<1x18x18x4xf32, #tpu.memory_space<vmem>>, vector<1x16x16x4xf32>
    %21 = vector.shape_cast %20 : vector<1x16x16x4xf32> to vector<16x16x4xf32>
    %c1_i32_15 = arith.constant 1 : i32
    %22 = arith.addi %1, %c1_i32_15 : i32
    %c0_16 = arith.constant 0 : index
    %23 = arith.index_cast %22 : i32 to index
    %c2_17 = arith.constant 2 : index
    %c0_18 = arith.constant 0 : index
    %24 = vector.load %arg2[%c0_16, %23, %c2_17, %c0_18] : memref<1x18x18x4xf32, #tpu.memory_space<vmem>>, vector<1x16x16x4xf32>
    %25 = vector.shape_cast %24 : vector<1x16x16x4xf32> to vector<16x16x4xf32>
    %c2_i32 = arith.constant 2 : i32
    %26 = arith.addi %1, %c2_i32 : i32
    %c0_19 = arith.constant 0 : index
    %27 = arith.index_cast %26 : i32 to index
    %c0_20 = arith.constant 0 : index
    %c0_21 = arith.constant 0 : index
    %28 = vector.load %arg2[%c0_19, %27, %c0_20, %c0_21] : memref<1x18x18x4xf32, #tpu.memory_space<vmem>>, vector<1x16x16x4xf32>
    %29 = vector.shape_cast %28 : vector<1x16x16x4xf32> to vector<16x16x4xf32>
    %c2_i32_22 = arith.constant 2 : i32
    %30 = arith.addi %1, %c2_i32_22 : i32
    %c0_23 = arith.constant 0 : index
    %31 = arith.index_cast %30 : i32 to index
    %c1_24 = arith.constant 1 : index
    %c0_25 = arith.constant 0 : index
    %32 = vector.load %arg2[%c0_23, %31, %c1_24, %c0_25] : memref<1x18x18x4xf32, #tpu.memory_space<vmem>>, vector<1x16x16x4xf32>
    %33 = vector.shape_cast %32 : vector<1x16x16x4xf32> to vector<16x16x4xf32>
    %c2_i32_26 = arith.constant 2 : i32
    %34 = arith.addi %1, %c2_i32_26 : i32
    %c0_27 = arith.constant 0 : index
    %35 = arith.index_cast %34 : i32 to index
    %c2_28 = arith.constant 2 : index
    %c0_29 = arith.constant 0 : index
    %36 = vector.load %arg2[%c0_27, %35, %c2_28, %c0_29] : memref<1x18x18x4xf32, #tpu.memory_space<vmem>>, vector<1x16x16x4xf32>
    %37 = vector.shape_cast %36 : vector<1x16x16x4xf32> to vector<16x16x4xf32>
    %38 = tpu.concatenate %5, %9, %13, %17, %21, %25, %29, %33, %37 in 2 : vector<16x16x4xf32>, vector<16x16x4xf32>, vector<16x16x4xf32>, vector<16x16x4xf32>, vector<16x16x4xf32>, vector<16x16x4xf32>, vector<16x16x4xf32>, vector<16x16x4xf32>, vector<16x16x4xf32> -> vector<16x16x36xf32>
    %39 = vector.shape_cast %38 : vector<16x16x36xf32> to vector<256x36xf32>
    %c0_30 = arith.constant 0 : index
    %c0_31 = arith.constant 0 : index
    %40 = vector.load %arg3[%c0_30, %c0_31] : memref<36x128xf32, #tpu.memory_space<vmem>>, vector<36x128xf32>
    %cst = arith.constant dense<0.000000e+00> : vector<256x128xf32>
    %41 = tpu.matmul %39, %40, %cst {dimension_numbers = #tpu.dot_dimension_numbers<[1], [0], [0], [1], [0, 0, 1, 1], [], []>} : vector<256x36xf32>, vector<36x128xf32>, vector<256x128xf32> -> vector<256x128xf32>
    %c0_32 = arith.constant 0 : index
    %c0_33 = arith.constant 0 : index
    %42 = vector.load %arg4[%c0_32, %c0_33] : memref<1x128xf32, #tpu.memory_space<vmem>>, vector<1x128xf32>
    %43 = vector.broadcast %42 : vector<1x128xf32> to vector<256x128xf32>
    %44 = arith.addf %41, %43 : vector<256x128xf32>
    %c0_34 = arith.constant 0 : index
    %c0_35 = arith.constant 0 : index
    %c0_36 = arith.constant 0 : index
    %45 = vector.load %arg5[%c0_34, %c0_35, %c0_36] : memref<1x256x128xf32, #tpu.memory_space<vmem>>, vector<1x256x128xf32>
    %46 = vector.shape_cast %45 : vector<1x256x128xf32> to vector<256x128xf32>
    %47 = vector.shape_cast %44 : vector<256x128xf32> to vector<1x256x128xf32>
    tpu.vector_store %arg5[%c0_34, %c0_35, %c0_36], %47 {strides = array<i32>} : memref<1x256x128xf32, #tpu.memory_space<vmem>>, vector<1x256x128xf32>,
    return
  }
  func.func @transform_0(%arg0: i32, %arg1: i32) -> (i32, i32, i32, i32) {
    %c0_i32 = arith.constant 0 : i32
    %c0_i32_0 = arith.constant 0 : i32
    %c0_i32_1 = arith.constant 0 : i32
    %c0_i32_2 = arith.constant 0 : i32
    return %arg0, %c0_i32, %c0_i32_0, %c0_i32_1 : i32, i32, i32, i32
  }
  func.func @transform_1(%arg0: i32, %arg1: i32) -> (i32, i32) {
    %c0_i32 = arith.constant 0 : i32
    %c0_i32_0 = arith.constant 0 : i32
    %c0_i32_1 = arith.constant 0 : i32
    return %c0_i32, %c0_i32_0 : i32, i32
  }
  func.func @transform_2(%arg0: i32, %arg1: i32) -> (i32, i32) {
    %c0_i32 = arith.constant 0 : i32
    %c0_i32_0 = arith.constant 0 : i32
    %c0_i32_1 = arith.constant 0 : i32
    return %c0_i32, %c0_i32_0 : i32, i32
  }
  func.func @transform_3(%arg0: i32, %arg1: i32) -> (i32, i32, i32) {
    %c0_i32 = arith.constant 0 : i32
    %c0_i32_0 = arith.constant 0 : i32
    return %arg0, %arg1, %c0_i32 : i32, i32, i32
  }
}

</mosaic_0001>

<bundles_post_ra>
// kernel: tpu_custom_call.1
= control target key start
LH: loop header
LB: loop body
LE: loop exit
PB: predicated region body
PF: predicated region fallthrough
CT: control target
= control target key end

     0   :  { %8 = vsyncpa [#allocation3], 0  ;;  %s4391_s0 = inlined_call_operand.vmem [shape: f32[2,18,18,4], index: 0, kind: input, shape index: {}]   ;;  %s4392_s1 = inlined_call_operand.vmem [shape: f32[36,128], index: 1, kind: input, shape index: {}]   ;;  %s4393_s2 = inlined_call_operand.vmem [shape: f32[1,128], index: 2, kind: input, shape index: {}]   ;;  %s4394_s3 = inlined_call_operand.hbm [shape: f32[2,256,128], index: 3, kind: output, shape index: {}]  }
   0x1   :  { %10 = vsyncpa [#allocation3 + $0x1], 0  ;;  %s2558_s12 = smov 0   ;;  %s2560_s13 = smov 0  }
   0x2   :  { %s2562_s14 = smov 0   ;;  %s2564_s15 = smov 0  }
   0x3   :  { %s2566_s16 = smov 0   ;;  %s2568_s17 = smov 0  }
   0x4 LB: > { %s2125_s18 = sadd.s32 4294967295, %s2527_s17   ;;  %s2126_s19 = sadd.s32 4294967294, %s2527_s17   ;;  %s2527_s17 = sphi %s2568_s17, %s16_s17   ;;  %s2523_s16 = sphi %s2566_s16, %s4682_s16   ;;  %s2519_s15 = sphi %s2564_s15, %s4681_s15   ;;  %s2515_s14 = sphi %s2562_s14, %s4680_s14   ;;  %s2511_s13 = sphi %s2560_s13, %s4679_s13   ;;  %s2507_s12 = sphi %s2558_s12, %s4678_s12  }
   0x5   : > { %s28_s20 = sadd.s32 1, %s2523_s16  ;;  %s105_s21 = sadd.s32 1, %s2515_s14 }
   0x6   : > { %p30_p0 = scmp.ge.s32.totalorder %s28_s20, 2  ;;  %p115_p1 = scmp.ne.s32.totalorder %s2515_s14, %s2511_s13 }
   0x7   : > { %p116_p2 = scmp.eq.s32.totalorder %s2125_s18, 1  ;;  %p121_p3 = scmp.ne.s32.totalorder %s2511_s13, %s2507_s12 }
   0x8   : > { %s4684_s20 = smov (%p30_p0, %s28_s20), 0  ;;  %p122_p5 = scmp.eq.s32.totalorder %s2126_s19, 1 }
   0x9   : > { %p2598_p4 = por %p116_p2, %p115_p1  ;;  %s100_s23 = ssub.s32 %s2523_s16, %s4684_s20 }
   0xa   : > { %p2129_p6 = scmp.ge.s32.totalorder %s2527_s17, 1  ;;  %p103_p7 = scmp.eq.s32.totalorder %s100_s23, 0 }
   0xb   : > { %p2605_p8 = por %p122_p5, %p121_p3  ;;  %p154_p9 = scmp.lt.s32.totalorder %s2527_s17, 3 }
   0xc   : > { %s2611_s25 = scalar_select %p103_p7, %s2515_s14, %s105_s21  }
   0xd   : > { %p155_p10 = pnand %p2129_p6, %p154_p9 }
   0xf   : > { %158 = sbr.rel (%p155_p10) target bundleno = 957 (0x3bd), region = 32 }
  0x14   : > { %p178_p11 = scmp.lt.s32.totalorder %s2519_s15, 1  ;;  %s2529_s4 = smov 4   ;;  %vm1505_vm0 = vcmask 31744   ;;  %vm1538_vm1 = vcmask 64512   ;;  %vm1571_vm2 = vcmask 97280   ;;  %vm1604_vm3 = vcmask 130048  }
  0x15   : > { %s2530_s5 = smov 8   ;;  %s2531_s6 = smov 12   ;;  %vm1637_vm4 = vcmask 162816   ;;  %vm1670_vm5 = vcmask 195584   ;;  %vm1875_vm6 = vcmask 1043456   ;;  %vm1703_vm7 = vcmask 228352  }
  0x16   : > { %s179_s26 = scalar_select %p178_p11, %s2519_s15, 1  ;;  %vm1736_vm8 = vcmask 261120   ;;  %vm1778_vm9 = vcmask 293888  }
  0x17   : > { %s2532_s7 = smov 16   ;;  %s2533_s8 = smov 20  }
  0x18   : > { %s2378_s27 = smul.u32 432, %s179_s26  ;;  %s2534_s9 = smov 24  }
  0x19   : > { %s2535_s10 = smov 32   ;;  %s2536_s11 = smov 28  }
  0x1a   : > { %s2618_s30 = scalar_lea.vmem %s4391_s0, %s2378_s27 }
  0x1b   : > { %v2621_v0 = vld [vmem:[%s2618_s30 + $0x31] sm:$0xff]  ;;  %v2624_v1 = vld [vmem:[%s2618_s30 + $0x19] sm:$0xff]  ;;  %v219_v2 = vld [vmem:[%s2618_s30 + $0x1] sm:$0xff] }
  0x1c   : > { %521 = vrot.lane.b32.xlu2 %v2621_v0, %s2529_s4  ;;  %517 = vrot.lane.b32.xlu1 %v2624_v1, %s2529_s4  ;;  %v2633_v3 = vld [vmem:[%s2618_s30 + $0x39] sm:$0xff]  ;;  %v2636_v4 = vld [vmem:[%s2618_s30 + $0x21] sm:$0xff] }
  0x1d   : > { %513 = vrot.lane.b32.xlu0 %v219_v2, %s2529_s4  ;;  %v220_v5 = vld [vmem:[%s2618_s30 + $0x9] sm:$0xff]  ;;  %v2645_v6 = vld [vmem:[%s2618_s30 + $0x61] sm:$0xff]  ;;  %v2648_v7 = vld [vmem:[%s2618_s30 + $0x51] sm:$0xff] }
  0x1e   : > { %v2651_v8 = vld [vmem:[%s2618_s30 + $0x49] sm:$0xff]  ;;  %v2660_v9 = vld [vmem:[%s2618_s30 + $0x81] sm:$0xff]  ;;  %v2663_v10 = vld [vmem:[%s2618_s30 + $0x79] sm:$0xff] }
  0x1f   : > { %v2666_v11 = vld [vmem:[%s2618_s30 + $0x69] sm:$0xff]  ;;  %v2678_v13 = vld [vmem:[%s2618_s30 + $0x99] sm:$0xff]  ;;  %v2681_v14 = vld [vmem:[%s2618_s30 + $0x91] sm:$0xff] }
  0x20   : > { %v2675_v12 = vld [vmem:[%s2618_s30 + $0xa9] sm:$0xff]  ;;  %v2693_v16 = vld [vmem:[%s2618_s30 + $0xc1] sm:$0xff]  ;;  %v2696_v17 = vld [vmem:[%s2618_s30 + $0xb1] sm:$0xff] }
  0x21   : > { %v2690_v15 = vld [vmem:[%s2618_s30 + $0xc9] sm:$0xff]  ;;  %v2705_v18 = vld [vmem:[%s2618_s30 + $0xf1] sm:$0xff]  ;;  %v2708_v19 = vld [vmem:[%s2618_s30 + $0xe1] sm:$0xff] }
  0x22   : > { %v2711_v20 = vld [vmem:[%s2618_s30 + $0xd9] sm:$0xff]  ;;  %v2720_v21 = vld [vmem:[%s2618_s30 + $0x111] sm:$0xff]  ;;  %v2723_v22 = vld [vmem:[%s2618_s30 + $0x109] sm:$0xff] }
  0x23   : > { %v2726_v23 = vld [vmem:[%s2618_s30 + $0xf9] sm:$0xff]  ;;  %v2738_v25 = vld [vmem:[%s2618_s30 + $0x129] sm:$0xff]  ;;  %v2741_v26 = vld [vmem:[%s2618_s30 + $0x121] sm:$0xff] }
  0x24   : > { %523 = vrot.lane.b32.xlu2 %v2633_v3, %s2529_s4  ;;  %519 = vrot.lane.b32.xlu1 %v2636_v4, %s2529_s4  ;;  %v2735_v24 = vld [vmem:[%s2618_s30 + $0x139] sm:$0xff]  ;;  %v2753_v28 = vld [vmem:[%s2618_s30 + $0x151] sm:$0xff] }
  0x25   : > { %515 = vrot.lane.b32.xlu0 %v220_v5, %s2529_s4  ;;  %v2750_v27 = vld [vmem:[%s2618_s30 + $0x159] sm:$0xff]  ;;  %v2756_v29 = vld [vmem:[%s2618_s30 + $0x141] sm:$0xff]  ;;  %v2766_v31 = vld [vmem:[%s2618_s30 + $0x171] sm:$0xff] }
  0x26   : > { %v251_v30 = vld [vmem:[%s2618_s30 + $0x2] sm:$0xff]  ;;  %v2780_v34 = vld [vmem:[%s2618_s30 + $0x1a] sm:$0xff]  ;;  %v252_v35 = vld [vmem:[%s2618_s30 + $0xa] sm:$0xff] }
  0x27   : > { %v2769_v32 = vld [vmem:[%s2618_s30 + $0x169] sm:$0xff]  ;;  %v2794_v38 = vld [vmem:[%s2618_s30 + $0x3a] sm:$0xff]  ;;  %v2797_v39 = vld [vmem:[%s2618_s30 + $0x32] sm:$0xff] }
  0x28   : > { %v2777_v33 = vld [vmem:[%s2618_s30 + $0x22] sm:$0xff]  ;;  %v2791_v37 = vld [vmem:[%s2618_s30 + $0x4a] sm:$0xff]  ;;  %v2814_v43 = vld [vmem:[%s2618_s30 + $0x52] sm:$0xff] }
  0x29   : > { %v2808_v41 = vld [vmem:[%s2618_s30 + $0x6a] sm:$0xff]  ;;  %v2811_v42 = vld [vmem:[%s2618_s30 + $0x62] sm:$0xff]  ;;  %v2825_v45 = vld [vmem:[%s2618_s30 + $0x92] sm:$0xff] }
  0x2a   : > { %v2828_v46 = vld [vmem:[%s2618_s30 + $0x82] sm:$0xff]  ;;  %v2831_v47 = vld [vmem:[%s2618_s30 + $0x7a] sm:$0xff]  ;;  %v2846_v51 = vld [vmem:[%s2618_s30 + $0xb2] sm:$0xff] }
  0x2b   : > { %v2849_v52 = vld [vmem:[%s2618_s30 + $0xaa] sm:$0xff]  ;;  %v2852_v53 = vld [vmem:[%s2618_s30 + $0x9a] sm:$0xff]  ;;  %v2873_v59 = vld [vmem:[%s2618_s30 + $0xc2] sm:$0xff] }
  0x2c   : > { %529 = vrot.lane.b32.xlu2 %v2645_v6, %s2529_s4  ;;  %527 = vrot.lane.b32.xlu1 %v2648_v7, %s2529_s4  ;;  %v2867_v57 = vld [vmem:[%s2618_s30 + $0xda] sm:$0xff]  ;;  %v2870_v58 = vld [vmem:[%s2618_s30 + $0xca] sm:$0xff] }
  0x2d   : > { %525 = vrot.lane.b32.xlu0 %v2651_v8, %s2529_s4  ;;  %v2888_v63 = vld [vmem:[%s2618_s30 + $0xfa] sm:$0xff]  ;;  %v2891_v2 = vld [vmem:[%s2618_s30 + $0xf2] sm:$0xff]  ;;  %v2894_v5 = vld [vmem:[%s2618_s30 + $0xe2] sm:$0xff] }
  0x34   : > { %535 = vrot.lane.b32.xlu2 %v2660_v9, %s2529_s4  ;;  %533 = vrot.lane.b32.xlu1 %v2663_v10, %s2529_s4 }
  0x35   : > { %531 = vrot.lane.b32.xlu0 %v2666_v11, %s2529_s4 }
  0x3c   : > { %541 = vrot.lane.b32.xlu2 %v2675_v12, %s2529_s4  ;;  %539 = vrot.lane.b32.xlu1 %v2678_v13, %s2529_s4 }
  0x3d   : > { %537 = vrot.lane.b32.xlu0 %v2681_v14, %s2529_s4 }
  0x44   : > { %547 = vrot.lane.b32.xlu2 %v2690_v15, %s2529_s4  ;;  %545 = vrot.lane.b32.xlu1 %v2693_v16, %s2529_s4 }
  0x45   : > { %543 = vrot.lane.b32.xlu0 %v2696_v17, %s2529_s4 }
  0x4c   : > { %553 = vrot.lane.b32.xlu2 %v2705_v18, %s2529_s4  ;;  %551 = vrot.lane.b32.xlu1 %v2708_v19, %s2529_s4 }
  0x4d   : > { %549 = vrot.lane.b32.xlu0 %v2711_v20, %s2529_s4 }
  0x54   : > { %559 = vrot.lane.b32.xlu2 %v2720_v21, %s2529_s4  ;;  %557 = vrot.lane.b32.xlu1 %v2723_v22, %s2529_s4 }
  0x55   : > { %555 = vrot.lane.b32.xlu0 %v2726_v23, %s2529_s4 }
  0x5c   : > { %565 = vrot.lane.b32.xlu2 %v2735_v24, %s2529_s4  ;;  %563 = vrot.lane.b32.xlu1 %v2738_v25, %s2529_s4 }
  0x5d   : > { %561 = vrot.lane.b32.xlu0 %v2741_v26, %s2529_s4 }
  0x64   : > { %571 = vrot.lane.b32.xlu2 %v2750_v27, %s2529_s4  ;;  %569 = vrot.lane.b32.xlu1 %v2753_v28, %s2529_s4 }
  0x65   : > { %567 = vrot.lane.b32.xlu0 %v2756_v29, %s2529_s4 }
  0x6c   : > { %641 = vrot.lane.b32.xlu2 %v251_v30, %s2530_s5  ;;  %575 = vrot.lane.b32.xlu1 %v2766_v31, %s2529_s4 }
  0x6d   : > { %573 = vrot.lane.b32.xlu0 %v2769_v32, %s2529_s4 }
  0x74   : > { %647 = vrot.lane.b32.xlu2 %v2777_v33, %s2530_s5  ;;  %645 = vrot.lane.b32.xlu1 %v2780_v34, %s2530_s5 }
  0x75   : > { %643 = vrot.lane.b32.xlu0 %v252_v35, %s2530_s5 }
  0x76   : > { %v2788_v36 = vpop.permute.xlu2 %521 }
  0x77   : > { %4443 = vst [vmem:[#allocation5_spill] sm:$0xff] %v2788_v36  ;;  %v2933_v36 = vld [vmem:[%s2618_s30 + $0x13a] sm:$0xff] }
  0x7c   : > { %653 = vrot.lane.b32.xlu2 %v2791_v37, %s2530_s5  ;;  %651 = vrot.lane.b32.xlu1 %v2794_v38, %s2530_s5 }
  0x7d   : > { %649 = vrot.lane.b32.xlu0 %v2797_v39, %s2530_s5 }
  0x7e   : > { %v2805_v40 = vpop.permute.xlu2 %523 }
  0x7f   : > { %4444 = vst [vmem:[#allocation6_spill] sm:$0xff] %v2805_v40  ;;  %v2912_v40 = vld [vmem:[%s2618_s30 + $0x112] sm:$0xff] }
  0x84   : > { %659 = vrot.lane.b32.xlu2 %v2808_v41, %s2530_s5  ;;  %657 = vrot.lane.b32.xlu1 %v2811_v42, %s2530_s5 }
  0x85   : > { %655 = vrot.lane.b32.xlu0 %v2814_v43, %s2530_s5 }
  0x86   : > { %v2822_v44 = vpop.permute.xlu2 %529 }
  0x87   : > { %4445 = vst [vmem:[#allocation7_spill] sm:$0xff] %v2822_v44 }
  0x8c   : > { %665 = vrot.lane.b32.xlu2 %v2825_v45, %s2530_s5  ;;  %663 = vrot.lane.b32.xlu1 %v2828_v46, %s2530_s5 }
  0x8d   : > { %661 = vrot.lane.b32.xlu0 %v2831_v47, %s2530_s5 }
  0x8e   : > { %v2839_v48 = vpop.permute.xlu2 %535  ;;  %v2841_v49 = vpop.permute.xlu1 %517 }
  0x8f   : > { %4446 = vst [vmem:[#allocation8_spill] sm:$0xff] %v2839_v48  ;;  %v2843_v50 = vpop.permute.xlu0 %513  ;;  %v2909_v48 = vld [vmem:[%s2618_s30 + $0x122] sm:$0xff] }
  0x90   : > { %4447 = vst [vmem:[#allocation9_spill] sm:$0xff] %v2841_v49  ;;  %v2972_v49 = vld [vmem:[%s2618_s30 + $0x172] sm:$0xff] }
  0x91   : > { %4448 = vst [vmem:[#allocation10_spill] sm:$0xff] %v2843_v50 }
  0x92   : > { %4471 = vst [vmem:[#allocation33_spill] sm:$0xff] %v2972_v49 }
  0x94   : > { %671 = vrot.lane.b32.xlu2 %v2846_v51, %s2530_s5  ;;  %669 = vrot.lane.b32.xlu1 %v2849_v52, %s2530_s5 }
  0x95   : > { %667 = vrot.lane.b32.xlu0 %v2852_v53, %s2530_s5 }
  0x96   : > { %v2860_v54 = vpop.permute.xlu2 %541  ;;  %v2862_v55 = vpop.permute.xlu1 %519 }
  0x97   : > { %4449 = vst [vmem:[#allocation11_spill] sm:$0xff] %v2860_v54  ;;  %v2864_v56 = vpop.permute.xlu0 %515  ;;  %v2957_v54 = vld [vmem:[%s2618_s30 + $0x152] sm:$0xff] }
  0x98   : > { %4450 = vst [vmem:[#allocation12_spill] sm:$0xff] %v2862_v55  ;;  %v2975_v55 = vld [vmem:[%s2618_s30 + $0x18] sm:$0xff] }
  0x99   : > { %4451 = vst [vmem:[#allocation13_spill] sm:$0xff] %v2864_v56  ;;  %v2936_v56 = vld [vmem:[%s2618_s30 + $0x12a] sm:$0xff] }
  0x9a   : > { %4467 = vst [vmem:[#allocation29_spill] sm:$0xff] %v2957_v54 }
  0x9b   : > { %4472 = vst [vmem:[#allocation34_spill] sm:$0xff] %v2975_v55 }
  0x9c   : > { %677 = vrot.lane.b32.xlu2 %v2867_v57, %s2530_s5  ;;  %675 = vrot.lane.b32.xlu1 %v2870_v58, %s2530_s5 }
  0x9d   : > { %673 = vrot.lane.b32.xlu0 %v2873_v59, %s2530_s5 }
  0x9e   : > { %v2881_v60 = vpop.permute.xlu2 %547  ;;  %v2883_v61 = vpop.permute.xlu1 %527 }
  0x9f   : > { %4452 = vst [vmem:[#allocation14_spill] sm:$0xff] %v2881_v60  ;;  %v2885_v62 = vpop.permute.xlu0 %525  ;;  %v2951_v60 = vld [vmem:[%s2618_s30 + $0x16a] sm:$0xff] }
  0xa0   : > { %4453 = vst [vmem:[#allocation15_spill] sm:$0xff] %v2883_v61  ;;  %v2930_v61 = vld [vmem:[%s2618_s30 + $0x142] sm:$0xff] }
  0xa1   : > { %4454 = vst [vmem:[#allocation16_spill] sm:$0xff] %v2885_v62  ;;  %v2915_v62 = vld [vmem:[%s2618_s30 + $0x10a] sm:$0xff] }
  0xa2   : > { %4461 = vst [vmem:[#allocation23_spill] sm:$0xff] %v2930_v61 }
  0xa3   : > { %4465 = vst [vmem:[#allocation27_spill] sm:$0xff] %v2951_v60 }
  0xa4   : > { %683 = vrot.lane.b32.xlu2 %v2888_v63, %s2530_s5  ;;  %681 = vrot.lane.b32.xlu1 %v2891_v2, %s2530_s5 }
  0xa5   : > { %679 = vrot.lane.b32.xlu0 %v2894_v5, %s2530_s5 }
  0xa6   : > { %v2902_v30 = vpop.permute.xlu2 %553  ;;  %v2904_v35 = vpop.permute.xlu1 %533 }
  0xa7   : > { %4455 = vst [vmem:[#allocation17_spill] sm:$0xff] %v2902_v30  ;;  %v2906_v44 = vpop.permute.xlu0 %531 }
  0xa8   : > { %4456 = vst [vmem:[#allocation18_spill] sm:$0xff] %v2904_v35 }
  0xa9   : > { %4457 = vst [vmem:[#allocation19_spill] sm:$0xff] %v2906_v44 }
  0xac   : > { %689 = vrot.lane.b32.xlu2 %v2909_v48, %s2530_s5  ;;  %687 = vrot.lane.b32.xlu1 %v2912_v40, %s2530_s5 }
  0xad   : > { %685 = vrot.lane.b32.xlu0 %v2915_v62, %s2530_s5 }
  0xae   : > { %v2923_v35 = vpop.permute.xlu2 %559  ;;  %v2925_v44 = vpop.permute.xlu1 %539 }
  0xaf   : > { %4458 = vst [vmem:[#allocation20_spill] sm:$0xff] %v2923_v35  ;;  %v2927_v50 = vpop.permute.xlu0 %537 }
  0xb0   : > { %4459 = vst [vmem:[#allocation21_spill] sm:$0xff] %v2925_v44  ;;  %v2954_v44 = vld [vmem:[%s2618_s30 + $0x15a] sm:$0xff] }
  0xb1   : > { %4460 = vst [vmem:[#allocation22_spill] sm:$0xff] %v2927_v50 }
  0xb2   : > { %4466 = vst [vmem:[#allocation28_spill] sm:$0xff] %v2954_v44 }
  0xb4   : > { %695 = vrot.lane.b32.xlu2 %v2930_v61, %s2530_s5  ;;  %693 = vrot.lane.b32.xlu1 %v2933_v36, %s2530_s5  ;;  %v192_v61 = vld [vmem:[%s2618_s30 + $0x38] sm:$0xff] }
  0xb5   : > { %691 = vrot.lane.b32.xlu0 %v2936_v56, %s2530_s5 }
  0xb6   : > { %v2944_v35 = vpop.permute.xlu2 %565  ;;  %v2946_v50 = vpop.permute.xlu1 %545 }
  0xb7   : > { %4462 = vst [vmem:[#allocation24_spill] sm:$0xff] %v2944_v35  ;;  %v2948_v30 = vpop.permute.xlu0 %543 }
  0xb8   : > { %4463 = vst [vmem:[#allocation25_spill] sm:$0xff] %v2946_v50 }
  0xb9   : > { %4464 = vst [vmem:[#allocation26_spill] sm:$0xff] %v2948_v30 }
  0xbc   : > { %701 = vrot.lane.b32.xlu2 %v2951_v60, %s2530_s5  ;;  %699 = vrot.lane.b32.xlu1 %v2954_v44, %s2530_s5  ;;  %v2978_v60 = vld [vmem:[%s2618_s30 + $0x20] sm:$0xff]  ;;  %v2997_v44 = vld [vmem:[%s2618_s30 + $0x30] sm:$0xff] }
  0xbd   : > { %697 = vrot.lane.b32.xlu0 %v2957_v54, %s2530_s5  ;;  %4473 = vst [vmem:[#allocation35_spill] sm:$0xff] %v2978_v60  ;;  %v2994_v54 = vld [vmem:[%s2618_s30 + $0x48] sm:$0xff] }
  0xbe   : > { %v2965_v35 = vpop.permute.xlu2 %571  ;;  %v2967_v50 = vpop.permute.xlu1 %551  ;;  %4477 = vst [vmem:[#allocation39_spill] sm:$0xff] %v2994_v54 }
  0xbf   : > { %4468 = vst [vmem:[#allocation30_spill] sm:$0xff] %v2965_v35  ;;  %v2969_v30 = vpop.permute.xlu0 %549 }
  0xc0   : > { %4469 = vst [vmem:[#allocation31_spill] sm:$0xff] %v2967_v50 }
  0xc1   : > { %4470 = vst [vmem:[#allocation32_spill] sm:$0xff] %v2969_v30 }
  0xc2   : > { %4478 = vst [vmem:[#allocation40_spill] sm:$0xff] %v2997_v44 }
  0xc4   : > { %771 = vrot.lane.b32.xlu2 %v2978_v60, %s2531_s6  ;;  %769 = vrot.lane.b32.xlu1 %v2975_v55, %s2531_s6  ;;  %v195_v55 = vld [vmem:[%s2618_s30 + $0x60] sm:$0xff]  ;;  %v3012_v60 = vld [vmem:[%s2618_s30 + $0x68] sm:$0xff] }
  0xc5   : > { %703 = vrot.lane.b32.xlu0 %v2972_v49, %s2530_s5  ;;  %4482 = vst [vmem:[#allocation44_spill] sm:$0xff] %v3012_v60  ;;  %v3015_v49 = vld [vmem:[%s2618_s30 + $0x50] sm:$0xff] }
  0xc6   : > { %v2986_v35 = vpop.permute.xlu2 %641  ;;  %v2988_v50 = vpop.permute.xlu1 %557  ;;  %4483 = vst [vmem:[#allocation45_spill] sm:$0xff] %v3015_v49 }
  0xc7   : > { %4474 = vst [vmem:[#allocation36_spill] sm:$0xff] %v2986_v35  ;;  %v2990_v30 = vpop.permute.xlu0 %555 }
  0xc8   : > { %4475 = vst [vmem:[#allocation37_spill] sm:$0xff] %v2988_v50 }
  0xc9   : > { %4476 = vst [vmem:[#allocation38_spill] sm:$0xff] %v2990_v30 }
  0xcc   : > { %777 = vrot.lane.b32.xlu2 %v2994_v54, %s2531_s6  ;;  %775 = vrot.lane.b32.xlu1 %v192_v61, %s2531_s6 }
  0xcd   : > { %773 = vrot.lane.b32.xlu0 %v2997_v44, %s2531_s6 }
  0xce   : > { %v3004_v35 = vpop.permute.xlu2 %647  ;;  %v3006_v50 = vpop.permute.xlu1 %563 }
  0xcf   : > { %4479 = vst [vmem:[#allocation41_spill] sm:$0xff] %v3004_v35  ;;  %v3008_v30 = vpop.permute.xlu0 %561  ;;  %v3033_v35 = vld [vmem:[%s2618_s30 + $0x78] sm:$0xff] }
  0xd0   : > { %4480 = vst [vmem:[#allocation42_spill] sm:$0xff] %v3006_v50  ;;  %v3030_v50 = vld [vmem:[%s2618_s30 + $0x90] sm:$0xff] }
  0xd1   : > { %4481 = vst [vmem:[#allocation43_spill] sm:$0xff] %v3008_v30  ;;  %v198_v30 = vld [vmem:[%s2618_s30 + $0x80] sm:$0xff] }
  0xd2   : > { %4487 = vst [vmem:[#allocation49_spill] sm:$0xff] %v3030_v50 }
  0xd3   : > { %4488 = vst [vmem:[#allocation50_spill] sm:$0xff] %v3033_v35 }
  0xd4   : > { %783 = vrot.lane.b32.xlu2 %v3012_v60, %s2531_s6  ;;  %781 = vrot.lane.b32.xlu1 %v195_v55, %s2531_s6  ;;  %v3047_v60 = vld [vmem:[%s2618_s30 + $0xa8] sm:$0xff] }
  0xd5   : > { %779 = vrot.lane.b32.xlu0 %v3015_v49, %s2531_s6  ;;  %4492 = vst [vmem:[#allocation54_spill] sm:$0xff] %v3047_v60  ;;  %v3053_v49 = vld [vmem:[%s2618_s30 + $0x98] sm:$0xff] }
  0xd6   : > { %v3022_v61 = vpop.permute.xlu2 %653  ;;  %v3024_v44 = vpop.permute.xlu1 %569  ;;  %4494 = vst [vmem:[#allocation56_spill] sm:$0xff] %v3053_v49 }
  0xd7   : > { %4484 = vst [vmem:[#allocation46_spill] sm:$0xff] %v3022_v61  ;;  %v3026_v54 = vpop.permute.xlu0 %567 }
  0xd8   : > { %4485 = vst [vmem:[#allocation47_spill] sm:$0xff] %v3024_v44 }
  0xd9   : > { %4486 = vst [vmem:[#allocation48_spill] sm:$0xff] %v3026_v54  ;;  %v3050_v54 = vld [vmem:[%s2618_s30 + $0xb0] sm:$0xff] }
  0xda   : > { %4493 = vst [vmem:[#allocation55_spill] sm:$0xff] %v3050_v54 }
  0xdc   : > { %789 = vrot.lane.b32.xlu2 %v3030_v50, %s2531_s6  ;;  %787 = vrot.lane.b32.xlu1 %v198_v30, %s2531_s6  ;;  %v3068_v50 = vld [vmem:[%s2618_s30 + $0xc8] sm:$0xff] }
  0xdd   : > { %785 = vrot.lane.b32.xlu0 %v3033_v35, %s2531_s6  ;;  %4498 = vst [vmem:[#allocation60_spill] sm:$0xff] %v3068_v50  ;;  %v3074_v35 = vld [vmem:[%s2618_s30 + $0xc0] sm:$0xff] }
  0xde   : > { %v3040_v55 = vpop.permute.xlu2 %659  ;;  %v3042_v61 = vpop.permute.xlu1 %575  ;;  %4500 = vst [vmem:[#allocation62_spill] sm:$0xff] %v3074_v35 }
  0xdf   : > { %4489 = vst [vmem:[#allocation51_spill] sm:$0xff] %v3040_v55  ;;  %v3044_v44 = vpop.permute.xlu0 %573 }
  0xe0   : > { %4490 = vst [vmem:[#allocation52_spill] sm:$0xff] %v3042_v61  ;;  %v3071_v61 = vld [vmem:[%s2618_s30 + $0xd8] sm:$0xff] }
  0xe1   : > { %4491 = vst [vmem:[#allocation53_spill] sm:$0xff] %v3044_v44 }
  0xe2   : > { %4499 = vst [vmem:[#allocation61_spill] sm:$0xff] %v3071_v61 }
  0xe4   : > { %795 = vrot.lane.b32.xlu2 %v3050_v54, %s2531_s6  ;;  %793 = vrot.lane.b32.xlu1 %v3047_v60, %s2531_s6  ;;  %v3089_v54 = vld [vmem:[%s2618_s30 + $0xf0] sm:$0xff] }
  0xe5   : > { %791 = vrot.lane.b32.xlu0 %v3053_v49, %s2531_s6  ;;  %4504 = vst [vmem:[#allocation66_spill] sm:$0xff] %v3089_v54  ;;  %v3095_v49 = vld [vmem:[%s2618_s30 + $0xe0] sm:$0xff] }
  0xe6   : > { %v3061_v30 = vpop.permute.xlu2 %665  ;;  %v3063_v55 = vpop.permute.xlu1 %645  ;;  %4506 = vst [vmem:[#allocation68_spill] sm:$0xff] %v3095_v49 }
  0xe7   : > { %4495 = vst [vmem:[#allocation57_spill] sm:$0xff] %v3061_v30  ;;  %v3065_v44 = vpop.permute.xlu0 %643 }
  0xe8   : > { %4496 = vst [vmem:[#allocation58_spill] sm:$0xff] %v3063_v55  ;;  %v3092_v55 = vld [vmem:[%s2618_s30 + $0xf8] sm:$0xff] }
  0xe9   : > { %4497 = vst [vmem:[#allocation59_spill] sm:$0xff] %v3065_v44 }
  0xea   : > { %4505 = vst [vmem:[#allocation67_spill] sm:$0xff] %v3092_v55 }
  0xec   : > { %801 = vrot.lane.b32.xlu2 %v3071_v61, %s2531_s6  ;;  %799 = vrot.lane.b32.xlu1 %v3068_v50, %s2531_s6  ;;  %v3110_v61 = vld [vmem:[%s2618_s30 + $0x110] sm:$0xff] }
  0xed   : > { %797 = vrot.lane.b32.xlu0 %v3074_v35, %s2531_s6  ;;  %4510 = vst [vmem:[#allocation72_spill] sm:$0xff] %v3110_v61  ;;  %v3116_v35 = vld [vmem:[%s2618_s30 + $0x108] sm:$0xff] }
  0xee   : > { %v3082_v30 = vpop.permute.xlu2 %671  ;;  %v3084_v44 = vpop.permute.xlu1 %651  ;;  %4512 = vst [vmem:[#allocation74_spill] sm:$0xff] %v3116_v35 }
  0xef   : > { %4501 = vst [vmem:[#allocation63_spill] sm:$0xff] %v3082_v30  ;;  %v3086_v60 = vpop.permute.xlu0 %649  ;;  %v3113_v30 = vld [vmem:[%s2618_s30 + $0x120] sm:$0xff] }
  0xf0   : > { %4502 = vst [vmem:[#allocation64_spill] sm:$0xff] %v3084_v44 }
  0xf1   : > { %4503 = vst [vmem:[#allocation65_spill] sm:$0xff] %v3086_v60 }
  0xf2   : > { %4511 = vst [vmem:[#allocation73_spill] sm:$0xff] %v3113_v30 }
  0xf4   : > { %807 = vrot.lane.b32.xlu2 %v3092_v55, %s2531_s6  ;;  %805 = vrot.lane.b32.xlu1 %v3089_v54, %s2531_s6  ;;  %v3131_v55 = vld [vmem:[%s2618_s30 + $0x138] sm:$0xff] }
  0xf5   : > { %803 = vrot.lane.b32.xlu0 %v3095_v49, %s2531_s6  ;;  %4516 = vst [vmem:[#allocation78_spill] sm:$0xff] %v3131_v55  ;;  %v3137_v49 = vld [vmem:[%s2618_s30 + $0x128] sm:$0xff] }
  0xf6   : > { %v3103_v44 = vpop.permute.xlu2 %677  ;;  %v3105_v60 = vpop.permute.xlu1 %657  ;;  %4518 = vst [vmem:[#allocation80_spill] sm:$0xff] %v3137_v49 }
  0xf7   : > { %4507 = vst [vmem:[#allocation69_spill] sm:$0xff] %v3103_v44  ;;  %v3107_v50 = vpop.permute.xlu0 %655  ;;  %v3134_v44 = vld [vmem:[%s2618_s30 + $0x140] sm:$0xff] }
  0xf8   : > { %4508 = vst [vmem:[#allocation70_spill] sm:$0xff] %v3105_v60 }
  0xf9   : > { %4509 = vst [vmem:[#allocation71_spill] sm:$0xff] %v3107_v50 }
  0xfa   : > { %4517 = vst [vmem:[#allocation79_spill] sm:$0xff] %v3134_v44 }
  0xfc   : > { %813 = vrot.lane.b32.xlu2 %v3113_v30, %s2531_s6  ;;  %811 = vrot.lane.b32.xlu1 %v3110_v61, %s2531_s6  ;;  %v3158_v30 = vld [vmem:[%s2618_s30 + $0x150] sm:$0xff] }
  0xfd   : > { %809 = vrot.lane.b32.xlu0 %v3116_v35, %s2531_s6  ;;  %v3155_v35 = vld [vmem:[%s2618_s30 + $0x168] sm:$0xff] }
  0xfe   : > { %v3124_v60 = vpop.permute.xlu2 %683  ;;  %v3126_v50 = vpop.permute.xlu1 %663  ;;  %4523 = vst [vmem:[#allocation85_spill] sm:$0xff] %v3155_v35 }
  0xff   : > { %4513 = vst [vmem:[#allocation75_spill] sm:$0xff] %v3124_v60  ;;  %v3128_v54 = vpop.permute.xlu0 %661  ;;  %v3152_v60 = vld [vmem:[%s2618_s30 + $0x158] sm:$0xff] }
 0x100   : > { %4514 = vst [vmem:[#allocation76_spill] sm:$0xff] %v3126_v50 }
 0x101   : > { %4515 = vst [vmem:[#allocation77_spill] sm:$0xff] %v3128_v54 }
 0x102   : > { %4522 = vst [vmem:[#allocation84_spill] sm:$0xff] %v3152_v60 }
 0x104   : > { %819 = vrot.lane.b32.xlu2 %v3134_v44, %s2531_s6  ;;  %817 = vrot.lane.b32.xlu1 %v3131_v55, %s2531_s6  ;;  %v2163_v44 = vld [vmem:[%s2618_s30 + $0x188] sm:$0xff] }
 0x105   : > { %815 = vrot.lane.b32.xlu0 %v3137_v49, %s2531_s6  ;;  %v3177_v49 = vld [vmem:[%s2618_s30 + $0x170] sm:$0xff] }
 0x106   : > { %v3145_v50 = vpop.permute.xlu2 %689  ;;  %v3147_v54 = vpop.permute.xlu1 %669 }
 0x107   : > { %4519 = vst [vmem:[#allocation81_spill] sm:$0xff] %v3145_v50  ;;  %v3149_v61 = vpop.permute.xlu0 %667  ;;  %v3174_v50 = vld [vmem:[%s2618_s30 + $0x180] sm:$0xff] }
 0x108   : > { %4520 = vst [vmem:[#allocation82_spill] sm:$0xff] %v3147_v54 }
 0x109   : > { %4521 = vst [vmem:[#allocation83_spill] sm:$0xff] %v3149_v61 }
 0x10a   : > { %4526 = vst [vmem:[#allocation88_spill] sm:$0xff] %v3174_v50 }
 0x10c   : > { %825 = vrot.lane.b32.xlu2 %v3155_v35, %s2531_s6  ;;  %823 = vrot.lane.b32.xlu1 %v3152_v60, %s2531_s6 }
 0x10d   : > { %821 = vrot.lane.b32.xlu0 %v3158_v30, %s2531_s6 }
 0x10e   : > { %v3166_v55 = vpop.permute.xlu2 %695  ;;  %v3168_v54 = vpop.permute.xlu1 %675 }
 0x10f   : > { %4524 = vst [vmem:[#allocation86_spill] sm:$0xff] %v3168_v54  ;;  %v3170_v61 = vpop.permute.xlu0 %673 }
 0x110   : > { %4525 = vst [vmem:[#allocation87_spill] sm:$0xff] %v3170_v61 }
 0x114   : > { %831 = vrot.lane.b32.xlu2 %v2163_v44, %s2531_s6  ;;  %829 = vrot.lane.b32.xlu1 %v3174_v50, %s2531_s6 }
 0x115   : > { %827 = vrot.lane.b32.xlu0 %v3177_v49, %s2531_s6  ;;  %s2469_s6 = scalar_lea.hbm %s4394_s3, 512 }
 0x116   : > { %v3184_v60 = vpop.permute.xlu2 %701  ;;  %v3186_v35 = vpop.permute.xlu1 %681 }
 0x117   : > { %v3188_v54 = vpop.permute.xlu0 %679 }
 0x11c   : > { %901 = vrot.lane.b32.xlu2 %v2621_v0, %s2532_s7  ;;  %899 = vrot.lane.b32.xlu1 %v2636_v4, %s2532_s7 }
 0x11d   : > { %897 = vrot.lane.b32.xlu0 %v2624_v1, %s2532_s7 }
 0x11e   : > { %v3196_v44 = vpop.permute.xlu2 %771  ;;  %v3198_v50 = vpop.permute.xlu1 %687 }
 0x11f   : > { %v3200_v61 = vpop.permute.xlu0 %685 }
 0x124   : > { %907 = vrot.lane.b32.xlu2 %v2648_v7, %s2532_s7  ;;  %905 = vrot.lane.b32.xlu1 %v2651_v8, %s2532_s7 }
 0x125   : > { %903 = vrot.lane.b32.xlu0 %v2633_v3, %s2532_s7 }
 0x126   : > { %v3208_v0 = vpop.permute.xlu2 %777  ;;  %v3210_v4 = vpop.permute.xlu1 %693 }
 0x127   : > { %v3212_v1 = vpop.permute.xlu0 %691 }
 0x12c   : > { %913 = vrot.lane.b32.xlu2 %v2663_v10, %s2532_s7  ;;  %911 = vrot.lane.b32.xlu1 %v2666_v11, %s2532_s7 }
 0x12d   : > { %909 = vrot.lane.b32.xlu0 %v2645_v6, %s2532_s7 }
 0x12e   : > { %v3220_v7 = vpop.permute.xlu2 %783  ;;  %v3222_v8 = vpop.permute.xlu1 %699 }
 0x12f   : > { %v3224_v3 = vpop.permute.xlu0 %697 }
 0x134   : > { %919 = vrot.lane.b32.xlu2 %v2678_v13, %s2532_s7  ;;  %917 = vrot.lane.b32.xlu1 %v2681_v14, %s2532_s7 }
 0x135   : > { %915 = vrot.lane.b32.xlu0 %v2660_v9, %s2532_s7 }
 0x136   : > { %v3232_v10 = vpop.permute.xlu2 %789  ;;  %v3234_v11 = vpop.permute.xlu1 %769 }
 0x137   : > { %4527 = vst [vmem:[#allocation89_spill] sm:$0xff] %v3232_v10  ;;  %v3236_v6 = vpop.permute.xlu0 %703  ;;  %v4559_v10 = vld [vmem:[#allocation41_spill] sm:$0xff] }
 0x138   : > { %4528 = vst [vmem:[#allocation90_spill] sm:$0xff] %v3234_v11 }
 0x13c   : > { %925 = vrot.lane.b32.xlu2 %v2693_v16, %s2532_s7  ;;  %923 = vrot.lane.b32.xlu1 %v2696_v17, %s2532_s7 }
 0x13d   : > { %921 = vrot.lane.b32.xlu0 %v2675_v12, %s2532_s7 }
 0x13e   : > { %v3244_v13 = vpop.permute.xlu2 %795  ;;  %v3246_v14 = vpop.permute.xlu1 %775 }
 0x13f   : > { %v3248_v9 = vpop.permute.xlu0 %773 }
 0x144   : > { %931 = vrot.lane.b32.xlu2 %v2708_v19, %s2532_s7  ;;  %929 = vrot.lane.b32.xlu1 %v2711_v20, %s2532_s7 }
 0x145   : > { %927 = vrot.lane.b32.xlu0 %v2690_v15, %s2532_s7 }
 0x146   : > { %v3256_v16 = vpop.permute.xlu2 %801  ;;  %v3258_v17 = vpop.permute.xlu1 %781 }
 0x147   : > { %4529 = vst [vmem:[#allocation91_spill] sm:$0xff] %v3258_v17  ;;  %v3260_v12 = vpop.permute.xlu0 %779  ;;  %v2232_v17 = vld [vmem:[%s2618_s30 + $0x60] sm:$0xff] }
 0x148   : > { %4530 = vst [vmem:[#allocation92_spill] sm:$0xff] %v3260_v12  ;;  %v3452_v12 = vld [vmem:[%s2618_s30 + $0x18a] sm:$0xff] }
 0x14c   : > { %937 = vrot.lane.b32.xlu2 %v2723_v22, %s2532_s7  ;;  %935 = vrot.lane.b32.xlu1 %v2726_v23, %s2532_s7 }
 0x14d   : > { %933 = vrot.lane.b32.xlu0 %v2705_v18, %s2532_s7 }
 0x14e   : > { %v3268_v19 = vpop.permute.xlu2 %807  ;;  %v3270_v20 = vpop.permute.xlu1 %787 }
 0x14f   : > { %4531 = vst [vmem:[#allocation93_spill] sm:$0xff] %v3270_v20  ;;  %v3272_v15 = vpop.permute.xlu0 %785  ;;  %v3311_v20 = vld [vmem:[%s2618_s30 + $0x189] sm:$0xff] }
 0x150   : > { %4532 = vst [vmem:[#allocation94_spill] sm:$0xff] %v3272_v15  ;;  %v3314_v15 = vld [vmem:[%s2618_s30 + $0x181] sm:$0xff] }
 0x151   : > { %4536 = vst [vmem:[#allocation98_spill] sm:$0xff] %v3311_v20 }
 0x152   : > { %4537 = vst [vmem:[#allocation99_spill] sm:$0xff] %v3314_v15 }
 0x154   : > { %943 = vrot.lane.b32.xlu2 %v2738_v25, %s2532_s7  ;;  %941 = vrot.lane.b32.xlu1 %v2741_v26, %s2532_s7 }
 0x155   : > { %939 = vrot.lane.b32.xlu0 %v2720_v21, %s2532_s7 }
 0x156   : > { %v3280_v22 = vpop.permute.xlu2 %813  ;;  %v3282_v18 = vpop.permute.xlu1 %793 }
 0x157   : > { %4533 = vst [vmem:[#allocation95_spill] sm:$0xff] %v3282_v18  ;;  %v3284_v23 = vpop.permute.xlu0 %791 }
 0x158   : > { %4534 = vst [vmem:[#allocation96_spill] sm:$0xff] %v3284_v23  ;;  %v3435_v23 = vld [vmem:[%s2618_s30 + $0x182] sm:$0xff] }
 0x15c   : > { %949 = vrot.lane.b32.xlu2 %v2753_v28, %s2532_s7  ;;  %947 = vrot.lane.b32.xlu1 %v2756_v29, %s2532_s7 }
 0x15d   : > { %945 = vrot.lane.b32.xlu0 %v2735_v24, %s2532_s7 }
 0x15e   : > { %v3292_v25 = vpop.permute.xlu2 %819  ;;  %v3294_v21 = vpop.permute.xlu1 %799 }
 0x15f   : > { %v3296_v26 = vpop.permute.xlu0 %797 }
 0x164   : > { %955 = vrot.lane.b32.xlu2 %v2766_v31, %s2532_s7  ;;  %953 = vrot.lane.b32.xlu1 %v2769_v32, %s2532_s7 }
 0x165   : > { %951 = vrot.lane.b32.xlu0 %v2750_v27, %s2532_s7 }
 0x166   : > { %v3304_v28 = vpop.permute.xlu2 %825  ;;  %v3306_v29 = vpop.permute.xlu1 %805 }
 0x167   : > { %4535 = vst [vmem:[#allocation97_spill] sm:$0xff] %v3304_v28  ;;  %v3308_v24 = vpop.permute.xlu0 %803  ;;  %v4563_v28 = vld [vmem:[#allocation43_spill] sm:$0xff] }
 0x16c   : > { %1025 = vrot.lane.b32.xlu2 %v2780_v34, %s2533_s8  ;;  %959 = vrot.lane.b32.xlu1 %v3311_v20, %s2532_s7 }
 0x16d   : > { %957 = vrot.lane.b32.xlu0 %v3314_v15, %s2532_s7 }
 0x16e   : > { %v3322_v27 = vpop.permute.xlu2 %831  ;;  %v3324_v31 = vpop.permute.xlu1 %811 }
 0x16f   : > { %v3326_v32 = vpop.permute.xlu0 %809 }
 0x174   : > { %1031 = vrot.lane.b32.xlu2 %v2794_v38, %s2533_s8  ;;  %1029 = vrot.lane.b32.xlu1 %v2797_v39, %s2533_s8 }
 0x175   : > { %1027 = vrot.lane.b32.xlu0 %v2777_v33, %s2533_s8 }
 0x176   : > { %v3334_v34 = vpop.permute.xlu2 %901  ;;  %v3336_v20 = vpop.permute.xlu1 %817 }
 0x177   : > { %v3338_v15 = vpop.permute.xlu0 %815 }
 0x17c   : > { %1037 = vrot.lane.b32.xlu2 %v2811_v42, %s2533_s8  ;;  %1035 = vrot.lane.b32.xlu1 %v2814_v43, %s2533_s8 }
 0x17d   : > { %1033 = vrot.lane.b32.xlu0 %v2791_v37, %s2533_s8 }
 0x17e   : > { %v3346_v38 = vpop.permute.xlu2 %907  ;;  %v3348_v39 = vpop.permute.xlu1 %823 }
 0x17f   : > { %4538 = vst [vmem:[#allocation100_spill] sm:$0xff] %v3346_v38  ;;  %v3350_v33 = vpop.permute.xlu0 %821  ;;  %v2229_v38 = vld [vmem:[%s2618_s30 + $0x38] sm:$0xff] }
 0x184   : > { %1043 = vrot.lane.b32.xlu2 %v2828_v46, %s2533_s8  ;;  %1041 = vrot.lane.b32.xlu1 %v2831_v47, %s2533_s8 }
 0x185   : > { %1039 = vrot.lane.b32.xlu0 %v2808_v41, %s2533_s8 }
 0x186   : > { %v3358_v42 = vpop.permute.xlu2 %913  ;;  %v3360_v43 = vpop.permute.xlu1 %829 }
 0x187   : > { %4539 = vst [vmem:[#allocation101_spill] sm:$0xff] %v3358_v42  ;;  %v3362_v37 = vpop.permute.xlu0 %827 }
 0x188   : > { %4540 = vst [vmem:[#allocation102_spill] sm:$0xff] %v3362_v37 }
 0x18c   : > { %1049 = vrot.lane.b32.xlu2 %v2849_v52, %s2533_s8  ;;  %1047 = vrot.lane.b32.xlu1 %v2852_v53, %s2533_s8 }
 0x18d   : > { %1045 = vrot.lane.b32.xlu0 %v2825_v45, %s2533_s8 }
 0x18e   : > { %v3370_v46 = vpop.permute.xlu2 %919  ;;  %v3372_v47 = vpop.permute.xlu1 %899 }
 0x18f   : > { %4541 = vst [vmem:[#allocation103_spill] sm:$0xff] %v3370_v46  ;;  %v3374_v41 = vpop.permute.xlu0 %897 }
 0x190   : > { %4542 = vst [vmem:[#allocation104_spill] sm:$0xff] %v3374_v41  ;;  %v4558_v41 = vld [vmem:[#allocation35_spill] sm:$0xff] }
 0x194   : > { %1055 = vrot.lane.b32.xlu2 %v2870_v58, %s2533_s8  ;;  %1053 = vrot.lane.b32.xlu1 %v2873_v59, %s2533_s8 }
 0x195   : > { %1051 = vrot.lane.b32.xlu0 %v2846_v51, %s2533_s8 }
 0x196   : > { %v3382_v52 = vpop.permute.xlu2 %925  ;;  %v3384_v53 = vpop.permute.xlu1 %905 }
 0x197   : > { %v904_v45 = vpop.permute.xlu0 %903 }
 0x19c   : > { %1061 = vrot.lane.b32.xlu2 %v2891_v2, %s2533_s8  ;;  %1059 = vrot.lane.b32.xlu1 %v2894_v5, %s2533_s8  ;;  %v4548_v5 = vld [vmem:[#allocation28_spill] sm:$0xff] }
 0x19d   : > { %1057 = vrot.lane.b32.xlu0 %v2867_v57, %s2533_s8  ;;  %4551 = vst [vmem:[#allocation28_spill] sm:$0xff] %v3435_v23 }
 0x19e   : > { %v3392_v58 = vpop.permute.xlu2 %931  ;;  %v3394_v59 = vpop.permute.xlu1 %911 }
 0x19f   : > { %4543 = vst [vmem:[#allocation105_spill] sm:$0xff] %v3394_v59  ;;  %v3396_v42 = vpop.permute.xlu0 %909  ;;  %v4564_v59 = vld [vmem:[#allocation73_spill] sm:$0xff] }
 0x1a0   : > { %4544 = vst [vmem:[#allocation106_spill] sm:$0xff] %v3396_v42  ;;  %v2228_v42 = vld [vmem:[%s2618_s30 + $0x30] sm:$0xff]  ;;  %v1530_v37 = vsel %vm1505_vm0, %v4564_v59, %v4563_v28 }
 0x1a4   : > { %1067 = vrot.lane.b32.xlu2 %v2912_v40, %s2533_s8  ;;  %1065 = vrot.lane.b32.xlu1 %v2915_v62, %s2533_s8 }
 0x1a5   : > { %1063 = vrot.lane.b32.xlu0 %v2888_v63, %s2533_s8 }
 0x1a6   : > { %v3404_v51 = vpop.permute.xlu2 %937  ;;  %v3406_v2 = vpop.permute.xlu1 %917 }
 0x1a7   : > { %4545 = vst [vmem:[#allocation107_spill] sm:$0xff] %v3406_v2  ;;  %v3408_v57 = vpop.permute.xlu0 %915  ;;  %v4557_v2 = vld [vmem:[#allocation12_spill] sm:$0xff] }
 0x1a8   : > { %4546 = vst [vmem:[#allocation108_spill] sm:$0xff] %v3408_v57  ;;  %v1509_v11 = vsel %vm1505_vm0, %v4558_v41, %v4557_v2  ;;  %v4566_v2 = vld [vmem:[#allocation81_spill] sm:$0xff] }
 0x1ac   : > { %1073 = vrot.lane.b32.xlu2 %v2933_v36, %s2533_s8  ;;  %1071 = vrot.lane.b32.xlu1 %v2936_v56, %s2533_s8  ;;  %v4549_v36 = vld [vmem:[#allocation29_spill] sm:$0xff]  ;;  %v4550_v56 = vld [vmem:[#allocation23_spill] sm:$0xff] }
 0x1ad   : > { %1069 = vrot.lane.b32.xlu0 %v2909_v48, %s2533_s8  ;;  %4555 = vst [vmem:[#allocation23_spill] sm:$0xff] %v3452_v12 }
 0x1ae   : > { %v3416_v40 = vpop.permute.xlu2 %943  ;;  %v3418_v62 = vpop.permute.xlu1 %923 }
 0x1af   : > { %v3420_v63 = vpop.permute.xlu0 %921 }
 0x1b0   : > { %4547 = vst [vmem:[#allocation109_spill] sm:$0xff] %v3420_v63  ;;  %v4552_v63 = vld [vmem:[#allocation33_spill] sm:$0xff] }
 0x1b4   : > { %1079 = vrot.lane.b32.xlu2 %v4548_v5, %s2533_s8  ;;  %1077 = vrot.lane.b32.xlu1 %v4549_v36, %s2533_s8  ;;  %v4553_v5 = vld [vmem:[#allocation27_spill] sm:$0xff] }
 0x1b5   : > { %1075 = vrot.lane.b32.xlu0 %v4550_v56, %s2533_s8 }
 0x1b6   : > { %v3428_v57 = vpop.permute.xlu2 %949  ;;  %v3430_v48 = vpop.permute.xlu1 %929 }
 0x1b7   : > { %v3432_v46 = vpop.permute.xlu0 %927 }
 0x1bc   : > { %1085 = vrot.lane.b32.xlu2 %v3435_v23, %s2533_s8  ;;  %1083 = vrot.lane.b32.xlu1 %v4552_v63, %s2533_s8 }
 0x1bd   : > { %1081 = vrot.lane.b32.xlu0 %v4553_v5, %s2533_s8 }
 0x1be   : > { %v3443_v36 = vpop.permute.xlu2 %955  ;;  %v3445_v56 = vpop.permute.xlu1 %935 }
 0x1bf   : > { %4554 = vst [vmem:[#allocation29_spill] sm:$0xff] %v3443_v36  ;;  %v3447_v18 = vpop.permute.xlu0 %933  ;;  %v4561_v36 = vld [vmem:[#allocation80_spill] sm:$0xff] }
 0x1c4   : > { %1155 = vrot.lane.b32.xlu2 %v2229_v38, %s2534_s9  ;;  %1153 = vrot.lane.b32.xlu1 %v2228_v42, %s2534_s9  ;;  %v1542_v38 = vsel %vm1538_vm1, %v1509_v11, %v4559_v10  ;;  %v4560_v42 = vld [vmem:[#allocation42_spill] sm:$0xff]  ;;  %v4565_v11 = vld [vmem:[#allocation39_spill] sm:$0xff] }
 0x1c5   : > { %1087 = vrot.lane.b32.xlu0 %v3452_v12, %s2533_s8  ;;  %v1531_v12 = vsel %vm1505_vm0, %v4561_v36, %v4560_v42  ;;  %v1575_v10 = vsel %vm1571_vm2, %v1542_v38, %v3246_v14 }
 0x1c6   : > { %v3458_v63 = vpop.permute.xlu2 %1025  ;;  %v3460_v5 = vpop.permute.xlu1 %941  ;;  %v1564_v41 = vsel %vm1538_vm1, %v1531_v12, %v3212_v1  ;;  %v1608_v42 = vsel %vm1604_vm3, %v1575_v10, %v904_v45  ;;  %v4567_v45 = vld [vmem:[#allocation50_spill] sm:$0xff]  ;;  %v4569_v10 = vld [vmem:[#allocation79_spill] sm:$0xff] }
 0x1c7   : > { %4556 = vst [vmem:[#allocation33_spill] sm:$0xff] %v3458_v63  ;;  %v3462_v23 = vpop.permute.xlu0 %939  ;;  %v4562_v63 = vld [vmem:[#allocation45_spill] sm:$0xff]  ;;  %v1597_v36 = vsel %vm1571_vm2, %v1564_v41, %v3292_v25  ;;  %v4568_v41 = vld [vmem:[#allocation48_spill] sm:$0xff] }
 0x1c8   : > { %v2235_v25 = vld [vmem:[%s2618_s30 + $0x80] sm:$0xff] }
 0x1cc   : > { %1161 = vrot.lane.b32.xlu2 %v2232_v17, %s2534_s9  ;;  %1159 = vrot.lane.b32.xlu1 %v4562_v63, %s2534_s9  ;;  %v1563_v17 = vsel %vm1538_vm1, %v1530_v37, %v4566_v2  ;;  %v4570_v2 = vld [vmem:[#allocation44_spill] sm:$0xff] }
 0x1cd   : > { %1157 = vrot.lane.b32.xlu0 %v4565_v11, %s2534_s9  ;;  %v1596_v1 = vsel %vm1571_vm2, %v1563_v17, %v3336_v20  ;;  %v1533_v20 = vsel %vm1505_vm0, %v4569_v10, %v4568_v41  ;;  %v2276_v11 = vld [vmem:[%s2618_s30 + $0xf1] sm:$0xff] }
 0x1ce   : > { %v1032_v28 = vpop.permute.xlu2 %1031  ;;  %v948_v59 = vpop.permute.xlu1 %947  ;;  %v1566_v17 = vsel %vm1538_vm1, %v1533_v20, %v3166_v55  ;;  %v4573_v55 = vld [vmem:[#allocation56_spill] sm:$0xff]  ;;  %v4574_v20 = vld [vmem:[#allocation49_spill] sm:$0xff] }
 0x1cf   : > { %v3493_v14 = vsel %vm1637_vm4, %v1608_v42, %v1032_v28  ;;  %v3496_v12 = vsel %vm1604_vm3, %v1597_v36, %v948_v59  ;;  %v946_v38 = vpop.permute.xlu0 %945  ;;  %v1599_v28 = vsel %vm1571_vm2, %v1566_v17, %v3348_v39 }
 0x1d0   : > { %v3499_v37 = vsel %vm1604_vm3, %v1596_v1, %v946_v38  ;;  %v2238_v38 = vld [vmem:[%s2618_s30 + $0xa8] sm:$0xff] }
 0x1d4   : > { %1167 = vrot.lane.b32.xlu2 %v2235_v25, %s2534_s9  ;;  %1165 = vrot.lane.b32.xlu1 %v4567_v45, %s2534_s9  ;;  %v4572_v25 = vld [vmem:[#allocation52_spill] sm:$0xff] }
 0x1d5   : > { %1163 = vrot.lane.b32.xlu0 %v4570_v2, %s2534_s9  ;;  %v1537_v41 = vsel %vm1505_vm0, %v3177_v49, %v4572_v25  ;;  %v4577_v25 = vld [vmem:[#allocation34_spill] sm:$0xff] }
 0x1d6   : > { %v3512_v36 = vpop.permute.xlu2 %1037  ;;  %v3514_v42 = vpop.permute.xlu1 %953  ;;  %v1570_v10 = vsel %vm1538_vm1, %v1537_v41, %v3236_v6  ;;  %v4578_v41 = vld [vmem:[#allocation58_spill] sm:$0xff] }
 0x1d7   : > { %4571 = vst [vmem:[#allocation27_spill] sm:$0xff] %v3512_v36  ;;  %v952_v59 = vpop.permute.xlu0 %951  ;;  %v1603_v39 = vsel %vm1571_vm2, %v1570_v10, %v3322_v27  ;;  %v4579_v27 = vld [vmem:[#allocation62_spill] sm:$0xff] }
 0x1d8   : > { %v3519_v1 = vsel %vm1604_vm3, %v1599_v28, %v952_v59  ;;  %v2241_v59 = vld [vmem:[%s2618_s30 + $0xc8] sm:$0xff] }
 0x1dc   : > { %1173 = vrot.lane.b32.xlu2 %v2238_v38, %s2534_s9  ;;  %1171 = vrot.lane.b32.xlu1 %v4573_v55, %s2534_s9  ;;  %v4576_v38 = vld [vmem:[#allocation9_spill] sm:$0xff] }
 0x1dd   : > { %1169 = vrot.lane.b32.xlu0 %v4574_v20, %s2534_s9  ;;  %v1508_v6 = vsel %vm1505_vm0, %v4577_v25, %v4576_v38 }
 0x1de   : > { %v3534_v2 = vpop.permute.xlu2 %1043  ;;  %v960_v17 = vpop.permute.xlu1 %959  ;;  %v1541_v20 = vsel %vm1538_vm1, %v1508_v6, %v4578_v41  ;;  %v4583_v41 = vld [vmem:[#allocation26_spill] sm:$0xff] }
 0x1df   : > { %4575 = vst [vmem:[#allocation12_spill] sm:$0xff] %v3534_v2  ;;  %v3537_v49 = vsel %vm1604_vm3, %v1603_v39, %v960_v17  ;;  %v3539_v28 = vpop.permute.xlu0 %957  ;;  %v1574_v10 = vsel %vm1571_vm2, %v1541_v20, %v3248_v9  ;;  %v4580_v39 = vld [vmem:[#allocation55_spill] sm:$0xff] }
 0x1e0   : > { %v1607_v17 = vsel %vm1604_vm3, %v1574_v10, %v3334_v34  ;;  %v1521_v36 = vsel %vm1505_vm0, %v4580_v39, %v4583_v41  ;;  %v4584_v9 = vld [vmem:[#allocation63_spill] sm:$0xff]  ;;  %v4585_v34 = vld [vmem:[#allocation68_spill] sm:$0xff] }
 0x1e1   : > { %v1554_v20 = vsel %vm1538_vm1, %v1521_v36, %v4584_v9  ;;  %v4589_v41 = vld [vmem:[#allocation32_spill] sm:$0xff]  ;;  %v4590_v9 = vld [vmem:[#allocation69_spill] sm:$0xff] }
 0x1e2   : > { %v1587_v10 = vsel %vm1571_vm2, %v1554_v20, %v3294_v21 }
 0x1e4   : > { %1179 = vrot.lane.b32.xlu2 %v2241_v59, %s2534_s9  ;;  %1177 = vrot.lane.b32.xlu1 %v4579_v27, %s2534_s9  ;;  %v2244_v59 = vld [vmem:[%s2618_s30 + $0xf0] sm:$0xff] }
 0x1e5   : > { %1175 = vrot.lane.b32.xlu0 %v4580_v39, %s2534_s9 }
 0x1e6   : > { %v3556_v2 = vpop.permute.xlu2 %1049  ;;  %v1030_v38 = vpop.permute.xlu1 %1029 }
 0x1e7   : > { %4581 = vst [vmem:[#allocation35_spill] sm:$0xff] %v3556_v2  ;;  %v3559_v25 = vsel %vm1637_vm4, %v1607_v17, %v1030_v38  ;;  %v3561_v6 = vpop.permute.xlu0 %1027  ;;  %v4586_v17 = vld [vmem:[#allocation61_spill] sm:$0xff]  ;;  %v1620_v38 = vsel %vm1604_vm3, %v1587_v10, %v3432_v46  ;;  %v4591_v46 = vld [vmem:[#allocation74_spill] sm:$0xff] }
 0x1e8   : > { %4582 = vst [vmem:[#allocation41_spill] sm:$0xff] %v3559_v25  ;;  %v1524_v21 = vsel %vm1505_vm0, %v4586_v17, %v4589_v41  ;;  %v4596_v25 = vld [vmem:[#allocation75_spill] sm:$0xff] }
 0x1e9   : > { %v1557_v20 = vsel %vm1538_vm1, %v1524_v21, %v4590_v9  ;;  %v2308_v9 = vld [vmem:[%s2618_s30 + $0xf2] sm:$0xff] }
 0x1ea   : > { %v1590_v10 = vsel %vm1571_vm2, %v1557_v20, %v3306_v29  ;;  %v4595_v29 = vld [vmem:[#allocation38_spill] sm:$0xff] }
 0x1ec   : > { %1185 = vrot.lane.b32.xlu2 %v2244_v59, %s2534_s9  ;;  %1183 = vrot.lane.b32.xlu1 %v4585_v34, %s2534_s9 }
 0x1ed   : > { %1181 = vrot.lane.b32.xlu0 %v4586_v17, %s2534_s9 }
 0x1ee   : > { %v1056_v2 = vpop.permute.xlu2 %1055  ;;  %v3578_v39 = vpop.permute.xlu1 %1035 }
 0x1ef   : > { %4587 = vst [vmem:[#allocation42_spill] sm:$0xff] %v3578_v39  ;;  %v3581_v36 = vsel %vm1637_vm4, %v1620_v38, %v1056_v2  ;;  %v3583_v59 = vpop.permute.xlu0 %1033  ;;  %v4592_v2 = vld [vmem:[#allocation67_spill] sm:$0xff]  ;;  %v1623_v38 = vsel %vm1604_vm3, %v1590_v10, %v3447_v18 }
 0x1f0   : > { %4588 = vst [vmem:[#allocation80_spill] sm:$0xff] %v3581_v36  ;;  %v2284_v39 = vld [vmem:[%s2618_s30 + $0x151] sm:$0xff]  ;;  %v1527_v20 = vsel %vm1505_vm0, %v4592_v2, %v4595_v29 }
 0x1f1   : > { %v1560_v18 = vsel %vm1538_vm1, %v1527_v20, %v4596_v25  ;;  %v2260_v29 = vld [vmem:[%s2618_s30 + $0x31] sm:$0xff] }
 0x1f2   : > { %v2316_v20 = vld [vmem:[%s2618_s30 + $0x152] sm:$0xff] }
 0x1f4   : > { %1201 = vrot.lane.b32.xlu2 %v3158_v30, %s2534_s9  ;;  %1189 = vrot.lane.b32.xlu1 %v4591_v46, %s2534_s9 }
 0x1f5   : > { %1187 = vrot.lane.b32.xlu0 %v4592_v2, %s2534_s9 }
 0x1f6   : > { %v1062_v36 = vpop.permute.xlu2 %1061  ;;  %v3600_v17 = vpop.permute.xlu1 %1041 }
 0x1f7   : > { %4593 = vst [vmem:[#allocation45_spill] sm:$0xff] %v3600_v17  ;;  %v3603_v41 = vsel %vm1637_vm4, %v1623_v38, %v1062_v36  ;;  %v3605_v21 = vpop.permute.xlu0 %1039  ;;  %v1593_v36 = vsel %vm1571_vm2, %v1560_v18, %v3324_v31  ;;  %v4598_v17 = vld [vmem:[#allocation54_spill] sm:$0xff]  ;;  %v4599_v18 = vld [vmem:[#allocation21_spill] sm:$0xff] }
 0x1f8   : > { %4594 = vst [vmem:[#allocation43_spill] sm:$0xff] %v3603_v41  ;;  %v1626_v10 = vsel %vm1604_vm3, %v1593_v36, %v3462_v23  ;;  %v4600_v23 = vld [vmem:[#allocation82_spill] sm:$0xff] }
 0x1fc   : > { %1441 = vrot.lane.b32.xlu2 %v2308_v9, %s2535_s10  ;;  %1329 = vrot.lane.b32.xlu1 %v2284_v39, %s2536_s11  ;;  %v2268_v9 = vld [vmem:[%s2618_s30 + $0x91] sm:$0xff] }
 0x1fd   : > { %1313 = vrot.lane.b32.xlu0 %v2276_v11, %s2536_s11  ;;  %v4597_v39 = vld [vmem:[#allocation11_spill] sm:$0xff]  ;;  %v1519_v11 = vsel %vm1505_vm0, %v4573_v55, %v4599_v18 }
 0x1fe   : > { %v1068_v38 = vpop.permute.xlu2 %1067  ;;  %v3622_v41 = vpop.permute.xlu1 %1047  ;;  %v1520_v31 = vsel %vm1505_vm0, %v4598_v17, %v4597_v39 }
 0x1ff   : > { %v3625_v2 = vsel %vm1637_vm4, %v1626_v10, %v1068_v38  ;;  %v3627_v25 = vpop.permute.xlu0 %1045  ;;  %v1553_v36 = vsel %vm1538_vm1, %v1520_v31, %v4600_v23  ;;  %v4601_v10 = vld [vmem:[#allocation83_spill] sm:$0xff] }
 0x200   : > { %v1552_v38 = vsel %vm1538_vm1, %v1519_v11, %v4601_v10  ;;  %v1586_v17 = vsel %vm1571_vm2, %v1553_v36, %v3296_v26  ;;  %v2292_v23 = vld [vmem:[%s2618_s30 + $0x32] sm:$0xff] }
 0x201   : > { %v1585_v55 = vsel %vm1571_vm2, %v1552_v38, %v3244_v13  ;;  %v1619_v39 = vsel %vm1604_vm3, %v1586_v17, %v3382_v52  ;;  %v2300_v13 = vld [vmem:[%s2618_s30 + $0x92] sm:$0xff]  ;;  %v4602_v52 = vld [vmem:[#allocation14_spill] sm:$0xff]  ;;  %v4604_v17 = vld [vmem:[#allocation25_spill] sm:$0xff] }
 0x202   : > { %v2253_v36 = vld [vmem:[%s2618_s30 + $0x158] sm:$0xff] }
 0x203   : > { %v4603_v10 = vld [vmem:[#allocation60_spill] sm:$0xff] }
 0x204   : > { %1297 = vrot.lane.b32.xlu2 %v2268_v9, %s2536_s11  ;;  %1281 = vrot.lane.b32.xlu1 %v2260_v29, %s2536_s11  ;;  %v1618_v9 = vsel %vm1604_vm3, %v1585_v55, %v3418_v62  ;;  %v1523_v38 = vsel %vm1505_vm0, %v4603_v10, %v4602_v52  ;;  %v1522_v62 = vsel %vm1505_vm0, %v4579_v27, %v4604_v17  ;;  %v2277_v17 = vld [vmem:[%s2618_s30 + $0xf9] sm:$0xff] }
 0x205   : > { %1457 = vrot.lane.b32.xlu0 %v2316_v20, %s2535_s10 }
 0x206   : > { %v1074_v31 = vpop.permute.xlu2 %1073  ;;  %v1054_v18 = vpop.permute.xlu1 %1053 }
 0x207   : > { %v3655_v29 = vsel %vm1637_vm4, %v3499_v37, %v1074_v31  ;;  %v3658_v11 = vsel %vm1637_vm4, %v1619_v39, %v1054_v18  ;;  %v1052_v26 = vpop.permute.xlu0 %1051  ;;  %v4605_v37 = vld [vmem:[#allocation86_spill] sm:$0xff]  ;;  %v4606_v39 = vld [vmem:[#allocation87_spill] sm:$0xff] }
 0x208   : > { %v3661_v20 = vsel %vm1637_vm4, %v1618_v9, %v1052_v26  ;;  %v1556_v55 = vsel %vm1538_vm1, %v1523_v38, %v4605_v37  ;;  %v1555_v31 = vsel %vm1538_vm1, %v1522_v62, %v4606_v39  ;;  %v2285_v38 = vld [vmem:[%s2618_s30 + $0x159] sm:$0xff]  ;;  %v4608_v62 = vld [vmem:[#allocation66_spill] sm:$0xff]  ;;  %v4611_v39 = vld [vmem:[#allocation31_spill] sm:$0xff] }
 0x209   : > { %v1589_v18 = vsel %vm1571_vm2, %v1556_v55, %v3308_v24  ;;  %v1588_v27 = vsel %vm1571_vm2, %v1555_v31, %v3256_v16  ;;  %v2309_v16 = vld [vmem:[%s2618_s30 + $0xfa] sm:$0xff]  ;;  %v1525_v31 = vsel %vm1505_vm0, %v4585_v34, %v4611_v39 }
 0x20a   : > { %v1622_v9 = vsel %vm1604_vm3, %v1589_v18, %v3392_v58  ;;  %v4607_v58 = vld [vmem:[#allocation17_spill] sm:$0xff] }
 0x20b   : > { %v1526_v37 = vsel %vm1505_vm0, %v4608_v62, %v4607_v58  ;;  %v4609_v55 = vld [vmem:[#allocation53_spill] sm:$0xff] }
 0x20c   : > { %1425 = vrot.lane.b32.xlu2 %v2300_v13, %s2535_s10  ;;  %1409 = vrot.lane.b32.xlu1 %v2292_v23, %s2535_s10  ;;  %v1621_v13 = vsel %vm1604_vm3, %v1588_v27, %v3430_v48  ;;  %v4610_v48 = vld [vmem:[#allocation85_spill] sm:$0xff]  ;;  %v1559_v27 = vsel %vm1538_vm1, %v1526_v37, %v3186_v35  ;;  %v4613_v37 = vld [vmem:[#allocation20_spill] sm:$0xff] }
 0x20d   : > { %1203 = vrot.lane.b32.xlu0 %v2253_v36, %s2534_s9  ;;  %v4612_v58 = vld [vmem:[#allocation13_spill] sm:$0xff] }
 0x20e   : > { %v1080_v26 = vpop.permute.xlu2 %1079  ;;  %v1060_v52 = vpop.permute.xlu1 %1059  ;;  %v2317_v62 = vld [vmem:[%s2618_s30 + $0x15a] sm:$0xff] }
 0x20f   : > { %v3689_v23 = vsel %vm1637_vm4, %v3519_v1, %v1080_v26  ;;  %v3692_v10 = vsel %vm1637_vm4, %v1622_v9, %v1060_v52  ;;  %v1058_v24 = vpop.permute.xlu0 %1057  ;;  %v1536_v1 = vsel %vm1505_vm0, %v4610_v48, %v4609_v55  ;;  %v1558_v9 = vsel %vm1538_vm1, %v1525_v31, %v3188_v54  ;;  %v4614_v55 = vld [vmem:[#allocation72_spill] sm:$0xff]  ;;  %v4616_v31 = vld [vmem:[#allocation37_spill] sm:$0xff] }
 0x210   : > { %v3695_v36 = vsel %vm1637_vm4, %v1621_v13, %v1058_v24  ;;  %v1569_v18 = vsel %vm1538_vm1, %v1536_v1, %v3184_v60  ;;  %v1592_v26 = vsel %vm1571_vm2, %v1559_v27, %v3326_v32  ;;  %v1591_v60 = vsel %vm1571_vm2, %v1558_v9, %v3268_v19  ;;  %v188_v24 = vld [vmem:[%s2618_s30 + $0x8] sm:$0xff]  ;;  %v4615_v1 = vld [vmem:[#allocation59_spill] sm:$0xff] }
 0x211   : > { %v1602_v34 = vsel %vm1571_vm2, %v1569_v18, %v3360_v43  ;;  %v1625_v35 = vsel %vm1604_vm3, %v1592_v26, %v3404_v51  ;;  %v1624_v32 = vsel %vm1604_vm3, %v1591_v60, %v3445_v56  ;;  %v2269_v51 = vld [vmem:[%s2618_s30 + $0x99] sm:$0xff]  ;;  %v1529_v56 = vsel %vm1505_vm0, %v4614_v55, %v4613_v37 }
 0x212   : > { %v1635_v52 = vsel %vm1604_vm3, %v1602_v34, %v3539_v28  ;;  %v1507_v28 = vsel %vm1505_vm0, %v188_v24, %v4612_v58  ;;  %v1528_v18 = vsel %vm1505_vm0, %v4591_v46, %v4616_v31  ;;  %v1562_v9 = vsel %vm1538_vm1, %v1529_v56, %v3198_v50  ;;  %v4617_v24 = vld [vmem:[#allocation5_spill] sm:$0xff] }
 0x213   : > { %v1540_v39 = vsel %vm1538_vm1, %v1507_v28, %v4615_v1  ;;  %v1561_v26 = vsel %vm1538_vm1, %v1528_v18, %v3200_v61  ;;  %v1595_v34 = vsel %vm1571_vm2, %v1562_v9, %v3338_v15  ;;  %v2286_v18 = vld [vmem:[%s2618_s30 + $0x169] sm:$0xff] }
 0x214   : > { %1443 = vrot.lane.b32.xlu2 %v2309_v16, %s2535_s10  ;;  %1331 = vrot.lane.b32.xlu1 %v2285_v38, %s2536_s11  ;;  %v1573_v27 = vsel %vm1571_vm2, %v1540_v39, %v3196_v44  ;;  %v1594_v50 = vsel %vm1571_vm2, %v1561_v26, %v3280_v22  ;;  %v1628_v44 = vsel %vm1604_vm3, %v1595_v34, %v3416_v40  ;;  %v2293_v40 = vld [vmem:[%s2618_s30 + $0x3a] sm:$0xff]  ;;  %v4623_v9 = vld [vmem:[#allocation30_spill] sm:$0xff] }
 0x215   : > { %1315 = vrot.lane.b32.xlu0 %v2277_v17, %s2536_s11  ;;  %v2261_v17 = vld [vmem:[%s2618_s30 + $0x39] sm:$0xff]  ;;  %v1606_v46 = vsel %vm1604_vm3, %v1573_v27, %v3372_v47  ;;  %v1627_v61 = vsel %vm1604_vm3, %v1594_v50, %v3460_v5  ;;  %v4622_v27 = vld [vmem:[#allocation15_spill] sm:$0xff] }
 0x216   : > { %v1086_v54 = vpop.permute.xlu2 %1085  ;;  %v1066_v13 = vpop.permute.xlu1 %1065  ;;  %v1639_v60 = vsel %vm1637_vm4, %v1606_v46, %v3561_v6  ;;  %v4624_v26 = vld [vmem:[#allocation84_spill] sm:$0xff]  ;;  %v4625_v46 = vld [vmem:[#allocation71_spill] sm:$0xff] }
 0x217   : > { %v3732_v43 = vsel %vm1637_vm4, %v1635_v52, %v1086_v54  ;;  %v3735_v16 = vsel %vm1637_vm4, %v1625_v35, %v1066_v13  ;;  %v1064_v38 = vpop.permute.xlu0 %1063  ;;  %v2301_v13 = vld [vmem:[%s2618_s30 + $0x9a] sm:$0xff]  ;;  %v1535_v34 = vsel %vm1505_vm0, %v4624_v26, %v4623_v9  ;;  %v4638_v9 = vld [vmem:[#allocation107_spill] sm:$0xff] }
 0x218   : > { %v3738_v19 = vsel %vm1637_vm4, %v1624_v32, %v1064_v38  ;;  %v4618_v32 = vld [vmem:[#allocation40_spill] sm:$0xff] }
 0x219   : > { %v1510_v6 = vsel %vm1505_vm0, %v4618_v32, %v4617_v24  ;;  %v4619_v38 = vld [vmem:[#allocation24_spill] sm:$0xff] }
 0x21c   : > { %1299 = vrot.lane.b32.xlu2 %v2269_v51, %s2536_s11  ;;  %1283 = vrot.lane.b32.xlu1 %v2261_v17, %s2536_s11  ;;  %v4620_v51 = vld [vmem:[#allocation78_spill] sm:$0xff]  ;;  %v4621_v17 = vld [vmem:[#allocation65_spill] sm:$0xff] }
 0x21d   : > { %1459 = vrot.lane.b32.xlu0 %v2317_v62, %s2535_s10  ;;  %v1532_v5 = vsel %vm1505_vm0, %v4620_v51, %v4619_v38  ;;  %v1543_v58 = vsel %vm1538_vm1, %v1510_v6, %v4621_v17  ;;  %v187_v6 = vld [vmem:[%s2618_s30] sm:$0xff] }
 0x21e   : > { %v1156_v35 = vpop.permute.xlu2 %1155  ;;  %v1072_v52 = vpop.permute.xlu1 %1071  ;;  %v1576_v28 = vsel %vm1571_vm2, %v1543_v58, %v3208_v0  ;;  %v1565_v62 = vsel %vm1538_vm1, %v1532_v5, %v3210_v4 }
 0x21f   : > { %v3775_v15 = vsel %vm1670_vm5, %v1639_v60, %v1156_v35  ;;  %v3778_v47 = vsel %vm1637_vm4, %v1628_v44, %v1072_v52  ;;  %v1070_v54 = vpop.permute.xlu0 %1069  ;;  %v1598_v37 = vsel %vm1571_vm2, %v1565_v62, %v3350_v33  ;;  %v1609_v55 = vsel %vm1604_vm3, %v1576_v28, %v3384_v53  ;;  %v4626_v44 = vld [vmem:[#allocation47_spill] sm:$0xff]  ;;  %v4627_v52 = vld [vmem:[#allocation102_spill] sm:$0xff] }
 0x220   : > { %v3781_v22 = vsel %vm1637_vm4, %v1627_v61, %v1070_v54  ;;  %v1631_v0 = vsel %vm1604_vm3, %v1598_v37, %v3428_v57  ;;  %v1642_v4 = vsel %vm1637_vm4, %v1609_v55, %v3583_v59  ;;  %v1513_v57 = vsel %vm1505_vm0, %v4562_v63, %v4622_v27  ;;  %v2278_v59 = vld [vmem:[%s2618_s30 + $0x109] sm:$0xff]  ;;  %v4628_v54 = vld [vmem:[#allocation105_spill] sm:$0xff] }
 0x221   : > { %v1546_v50 = vsel %vm1538_vm1, %v1513_v57, %v4625_v46  ;;  %v1568_v35 = vsel %vm1538_vm1, %v1535_v34, %v3222_v8  ;;  %v2270_v28 = vld [vmem:[%s2618_s30 + $0xa9] sm:$0xff]  ;;  %v4639_v34 = vld [vmem:[#allocation33_spill] sm:$0xff] }
 0x222   : > { %v1579_v60 = vsel %vm1571_vm2, %v1546_v50, %v3220_v7  ;;  %v1601_v61 = vsel %vm1571_vm2, %v1568_v35, %v4627_v52  ;;  %v4629_v7 = vld [vmem:[#allocation97_spill] sm:$0xff]  ;;  %v2262_v62 = vld [vmem:[%s2618_s30 + $0x49] sm:$0xff] }
 0x223   : > { %v4631_v37 = vld [vmem:[#allocation10_spill] sm:$0xff] }
 0x224   : > { %1427 = vrot.lane.b32.xlu2 %v2301_v13, %s2535_s10  ;;  %1411 = vrot.lane.b32.xlu1 %v2293_v40, %s2535_s10  ;;  %v4630_v13 = vld [vmem:[#allocation29_spill] sm:$0xff]  ;;  %v4632_v55 = vld [vmem:[#allocation18_spill] sm:$0xff] }
 0x225   : > { %1205 = vrot.lane.b32.xlu0 %v4610_v48, %s2534_s9  ;;  %v2310_v48 = vld [vmem:[%s2618_s30 + $0x10a] sm:$0xff]  ;;  %v1634_v40 = vsel %vm1604_vm3, %v1601_v61, %v4630_v13 }
 0x226   : > { %v1162_v56 = vpop.permute.xlu2 %1161  ;;  %v1078_v1 = vpop.permute.xlu1 %1077  ;;  %v4636_v27 = vld [vmem:[#allocation90_spill] sm:$0xff] }
 0x227   : > { %v3810_v39 = vsel %vm1670_vm5, %v1642_v4, %v1162_v56  ;;  %v3813_v31 = vsel %vm1637_vm4, %v1631_v0, %v1078_v1  ;;  %v1076_v33 = vpop.permute.xlu0 %1075  ;;  %v1516_v0 = vsel %vm1505_vm0, %v4567_v45, %v4632_v55  ;;  %v4633_v4 = vld [vmem:[#allocation36_spill] sm:$0xff]  ;;  %v4634_v1 = vld [vmem:[#allocation77_spill] sm:$0xff]  ;;  %v2294_v61 = vld [vmem:[%s2618_s30 + $0x4a] sm:$0xff] }
 0x228   : > { %v3817_v53 = vsel %vm1637_vm4, %v3496_v12, %v1076_v33  ;;  %v1534_v12 = vsel %vm1505_vm0, %v3158_v30, %v4626_v44  ;;  %v1612_v30 = vsel %vm1604_vm3, %v1579_v60, %v4628_v54  ;;  %v1549_v33 = vsel %vm1538_vm1, %v1516_v0, %v4634_v1  ;;  %v4637_v45 = vld [vmem:[#allocation104_spill] sm:$0xff]  ;;  %v2255_v54 = vld [vmem:[%s2618_s30 + $0x170] sm:$0xff]  ;;  %v4644_v0 = vld [vmem:[#allocation46_spill] sm:$0xff] }
 0x229   : > { %v1567_v63 = vsel %vm1538_vm1, %v1534_v12, %v3224_v3  ;;  %v1645_v24 = vsel %vm1637_vm4, %v1612_v30, %v3605_v21  ;;  %v1506_v21 = vsel %vm1505_vm0, %v187_v6, %v4631_v37  ;;  %v2247_v30 = vld [vmem:[%s2618_s30 + $0x110] sm:$0xff]  ;;  %v4641_v6 = vld [vmem:[#allocation16_spill] sm:$0xff] }
 0x22a   : > { %v1600_v8 = vsel %vm1571_vm2, %v1567_v63, %v4629_v7  ;;  %v1539_v56 = vsel %vm1538_vm1, %v1506_v21, %v4633_v4  ;;  %v2444_v37 = vld [vmem:[%s2618_s30 + $0x38] sm:$0xff]  ;;  %v4643_v21 = vld [vmem:[#allocation6_spill] sm:$0xff]  ;;  %v4646_v1 = vld [vmem:[#allocation91_spill] sm:$0xff] }
 0x22b   : > { %v1633_v38 = vsel %vm1604_vm3, %v1600_v8, %v3514_v42  ;;  %v2318_v42 = vld [vmem:[%s2618_s30 + $0x16a] sm:$0xff]  ;;  %v1572_v57 = vsel %vm1571_vm2, %v1539_v56, %v4636_v27  ;;  %v1511_v55 = vsel %vm1505_vm0, %v2444_v37, %v4643_v21  ;;  %v4645_v4 = vld [vmem:[#allocation64_spill] sm:$0xff]  ;;  %v4654_v21 = vld [vmem:[#allocation57_spill] sm:$0xff] }
 0x22c   : > { %1445 = vrot.lane.b32.xlu2 %v2310_v48, %s2535_s10  ;;  %1333 = vrot.lane.b32.xlu1 %v2286_v18, %s2536_s11  ;;  %v4635_v48 = vld [vmem:[#allocation89_spill] sm:$0xff]  ;;  %v1544_v56 = vsel %vm1538_vm1, %v1511_v55, %v4645_v4  ;;  %v4648_v27 = vld [vmem:[#allocation106_spill] sm:$0xff]  ;;  %v4656_v4 = vld [vmem:[#allocation95_spill] sm:$0xff] }
 0x22d   : > { %1317 = vrot.lane.b32.xlu0 %v2278_v59, %s2536_s11  ;;  %v1582_v18 = vsel %vm1571_vm2, %v1549_v33, %v4635_v48  ;;  %v1605_v59 = vsel %vm1604_vm3, %v1572_v57, %v4637_v45  ;;  %v4647_v48 = vld [vmem:[#allocation92_spill] sm:$0xff]  ;;  %v1770_v45 = vld [vmem:[%s4392_s1 + $0x8] sm:$0xff] }
 0x22e   : > { %v1168_v3 = vpop.permute.xlu2 %1167  ;;  %v1084_v32 = vpop.permute.xlu1 %1083  ;;  %v1615_v26 = vsel %vm1604_vm3, %v1582_v18, %v4638_v9  ;;  %v1638_v46 = vsel %vm1637_vm4, %v1605_v59, %v4639_v34  ;;  %v1577_v18 = vsel %vm1571_vm2, %v1544_v56, %v4647_v48  ;;  %v4649_v59 = vld [vmem:[#allocation100_spill] sm:$0xff] }
 0x22f   : > { %v3856_v51 = vsel %vm1670_vm5, %v1645_v24, %v1168_v3  ;;  %v3859_v5 = vsel %vm1637_vm4, %v1634_v40, %v1084_v32  ;;  %v1082_v17 = vpop.permute.xlu0 %1081  ;;  %v1648_v50 = vsel %vm1637_vm4, %v1615_v26, %v3627_v25  ;;  %v1773_v40 = vld [vmem:[%s4392_s1 + $0x20] sm:$0xf]  ;;  %v2287_v32 = vld [vmem:[%s2618_s30 + $0x171] sm:$0xff]  ;;  %v1610_v9 = vsel %vm1604_vm3, %v1577_v18, %v4649_v59 }
 0x230   : > { %v3862_v58 = vsel %vm1637_vm4, %v1633_v38, %v1082_v17  ;;  %v4640_v24 = vld [vmem:[#allocation41_spill] sm:$0xff]  ;;  %2363 = vmatpush.msk.msra.mxu1 %vm1875_vm6, %v1773_v40  ;;  %2364 = vmatpush.msk.msra.mxu2 %vm1875_vm6, %v1773_v40  ;;  %v4642_v38 = vld [vmem:[#allocation39_spill] sm:$0xff] }
 0x231   : > { %2365 = vmatpush.msk.msra.mxu3 %vm1875_vm6, %v1773_v40  ;;  %2324 = vmatpush.msk.msra.mxu0 %vm1875_vm6, %v1773_v40  ;;  %v1512_v17 = vsel %vm1505_vm0, %v4642_v38, %v4641_v6  ;;  %v4650_v26 = vld [vmem:[#allocation27_spill] sm:$0xff]  ;;  %v4652_v6 = vld [vmem:[#allocation22_spill] sm:$0xff]  ;;  %v4659_v18 = vld [vmem:[#allocation109_spill] sm:$0xff] }
 0x232   : > { %v4661_v59 = vld [vmem:[#allocation35_spill] sm:$0xff] }
 0x234   : > { %1301 = vrot.lane.b32.xlu2 %v2270_v28, %s2536_s11  ;;  %1285 = vrot.lane.b32.xlu1 %v2262_v62, %s2536_s11  ;;  %v2302_v28 = vld [vmem:[%s2618_s30 + $0xaa] sm:$0xff] }
 0x235   : > { %1461 = vrot.lane.b32.xlu0 %v2318_v42, %s2535_s10  ;;  %v1771_v62 = vld [vmem:[%s4392_s1 + $0x10] sm:$0xff]  ;;  %v1545_v42 = vsel %vm1538_vm1, %v1512_v17, %v4644_v0  ;;  %v4655_v0 = vld [vmem:[#allocation76_spill] sm:$0xff] }
 0x236   : > { %v1174_v44 = vpop.permute.xlu2 %1173  ;;  %v1154_v12 = vpop.permute.xlu1 %1153  ;;  %v1578_v33 = vsel %vm1571_vm2, %v1545_v42, %v4646_v1  ;;  %v2271_v17 = vld [vmem:[%s2618_s30 + $0xb1] sm:$0xff] }
 0x237   : > { %v3892_v60 = vsel %vm1670_vm5, %v1648_v50, %v1174_v44  ;;  %v3895_v35 = vsel %vm1670_vm5, %v1638_v46, %v1154_v12  ;;  %v1088_v63 = vpop.permute.xlu0 %1087  ;;  %v1611_v57 = vsel %vm1604_vm3, %v1578_v33, %v4648_v27  ;;  %v4651_v44 = vld [vmem:[#allocation42_spill] sm:$0xff]  ;;  %v4657_v1 = vld [vmem:[#allocation88_spill] sm:$0xff] }
 0x238   : > { %v3899_v52 = vsel %vm1637_vm4, %v3537_v49, %v1088_v63  ;;  %v1644_v34 = vsel %vm1637_vm4, %v1611_v57, %v4650_v26  ;;  %v1643_v12 = vsel %vm1637_vm4, %v1610_v9, %v4651_v44  ;;  %v4658_v33 = vld [vmem:[#allocation96_spill] sm:$0xff]  ;;  %v4660_v57 = vld [vmem:[#allocation103_spill] sm:$0xff] }
 0x23c   : > { %1413 = vrot.lane.b32.xlu2 %v2294_v61, %s2535_s10  ;;  %1207 = vrot.lane.b32.xlu1 %v2255_v54, %s2534_s9  ;;  %v1769_v54 = vld [vmem:[%s4392_s1] sm:$0xff] }
 0x23d   : > { %1191 = vrot.lane.b32.xlu0 %v2247_v30, %s2534_s9 }
 0x23e   : > { %v1180_v25 = vpop.permute.xlu2 %1179  ;;  %v1160_v7 = vpop.permute.xlu1 %1159 }
 0x23f   : > { %v3909_v8 = vsel %vm1670_vm5, %v3661_v20, %v1180_v25  ;;  %v3913_v49 = vsel %vm1670_vm5, %v3493_v14, %v1160_v7  ;;  %v1158_v13 = vpop.permute.xlu0 %1157  ;;  %v1772_v20 = vld [vmem:[%s4392_s1 + $0x18] sm:$0xff] }
 0x240   : > { %v3920_v3 = vsel %vm1670_vm5, %v4640_v24, %v1158_v13  ;;  %v2279_v14 = vld [vmem:[%s2618_s30 + $0x111] sm:$0xff]  ;;  %2366 = vmatpush.msra.mxu1 %v1772_v20  ;;  %2367 = vmatpush.msra.mxu2 %v1772_v20 }
 0x241   : > { %2368 = vmatpush.msra.mxu3 %v1772_v20  ;;  %1891 = vmatpush.msra.mxu0 %v1772_v20  ;;  %v2263_v25 = vld [vmem:[%s2618_s30 + $0x51] sm:$0xff] }
 0x242   : > { %2369 = vmatpush.msra.mxu1 %v1771_v62  ;;  %2370 = vmatpush.msra.mxu2 %v1771_v62  ;;  %v2319_v7 = vld [vmem:[%s2618_s30 + $0x172] sm:$0xff] }
 0x243   : > { %2371 = vmatpush.msra.mxu3 %v1771_v62  ;;  %1892 = vmatpush.msra.mxu0 %v1771_v62  ;;  %v2311_v13 = vld [vmem:[%s2618_s30 + $0x112] sm:$0xff] }
 0x244   : > { %1335 = vrot.lane.b32.xlu2 %v2287_v32, %s2536_s11  ;;  %1319 = vrot.lane.b32.xlu1 %v2279_v14, %s2536_s11  ;;  %v2248_v32 = vld [vmem:[%s2618_s30 + $0x120] sm:$0xff]  ;;  %v2445_v14 = vld [vmem:[%s2618_s30 + $0x90] sm:$0xff]  ;;  %v4653_v62 = vld [vmem:[#allocation8_spill] sm:$0xff] }
 0x245   : > { %1429 = vrot.lane.b32.xlu0 %v2302_v28, %s2535_s10  ;;  %2372 = vmatpush.msra.mxu1 %v1770_v45  ;;  %v1518_v38 = vsel %vm1505_vm0, %v2445_v14, %v4652_v6  ;;  %v2446_v28 = vld [vmem:[%s2618_s30 + $0x80] sm:$0xff] }
 0x246   : > { %v3957_v46 = vpop.permute.xlu2 %1185  ;;  %v1166_v50 = vpop.permute.xlu1 %1165  ;;  %2373 = vmatpush.msra.mxu2 %v1770_v45  ;;  %2374 = vmatpush.msra.mxu3 %v1770_v45  ;;  %v1517_v37 = vsel %vm1505_vm0, %v2446_v28, %v4653_v62  ;;  %v1551_v55 = vsel %vm1538_vm1, %v1518_v38, %v4654_v21  ;;  %v2447_v38 = vld [vmem:[%s2618_s30 + $0x60] sm:$0xff] }
 0x247   : > { %v3962_v63 = vsel %vm1670_vm5, %v1644_v34, %v1166_v50  ;;  %v1164_v61 = vpop.permute.xlu0 %1163  ;;  %2375 = vmatpush.msra.mxu1 %v1769_v54  ;;  %1893 = vmatpush.msra.mxu0 %v1770_v45  ;;  %v1550_v42 = vsel %vm1538_vm1, %v1517_v37, %v4655_v0  ;;  %v1584_v56 = vsel %vm1571_vm2, %v1551_v55, %v4656_v4  ;;  %v4664_v37 = vld [vmem:[#allocation70_spill] sm:$0xff]  ;;  %v4666_v4 = vld [vmem:[#allocation101_spill] sm:$0xff] }
 0x248   : > { %v3968_v30 = vsel %vm1670_vm5, %v1643_v12, %v1164_v61  ;;  %2376 = vmatpush.msra.mxu2 %v1769_v54  ;;  %2377 = vmatpush.msra.mxu3 %v1769_v54  ;;  %v1583_v48 = vsel %vm1571_vm2, %v1550_v42, %v4658_v33  ;;  %v1617_v27 = vsel %vm1604_vm3, %v1584_v56, %v4659_v18  ;;  %v2312_v55 = vld [vmem:[%s2618_s30 + $0x122] sm:$0xff]  ;;  %v4669_v18 = vld [vmem:[#allocation99_spill] sm:$0xff] }
 0x249   : > { %1894 = vmatpush.msra.mxu0 %v1769_v54  ;;  %v1616_v45 = vsel %vm1604_vm3, %v1583_v48, %v4660_v57  ;;  %v1650_v9 = vsel %vm1637_vm4, %v1617_v27, %v4661_v59  ;;  %v2280_v54 = vld [vmem:[%s2618_s30 + $0x121] sm:$0xff] }
 0x24a   : > { %v1649_v50 = vsel %vm1637_vm4, %v1616_v45, %v3622_v41  ;;  %v4662_v41 = vld [vmem:[#allocation80_spill] sm:$0xff]  ;;  %v4665_v0 = vld [vmem:[#allocation94_spill] sm:$0xff] }
 0x24c   : > { %1287 = vrot.lane.b32.xlu2 %v2263_v25, %s2536_s11  ;;  %1463 = vrot.lane.b32.xlu1 %v2319_v7, %s2535_s10  ;;  %v2303_v25 = vld [vmem:[%s2618_s30 + $0xb2] sm:$0xff] }
 0x24d   : > { %1447 = vrot.lane.b32.xlu0 %v2311_v13, %s2535_s10  ;;  %v2295_v7 = vld [vmem:[%s2618_s30 + $0x52] sm:$0xff] }
 0x24e   : > { %v3976_v40 = vpop.permute.xlu2 %1201  ;;  %v3978_v24 = vpop.permute.xlu1 %1171 }
 0x24f   : > { %v1170_v20 = vpop.permute.xlu0 %1169 }
 0x254   : > { %1209 = vrot.lane.b32.xlu2 %v4657_v1, %s2534_s9  ;;  %1193 = vrot.lane.b32.xlu1 %v2248_v32, %s2534_s9  ;;  %v4667_v1 = vld [vmem:[#allocation45_spill] sm:$0xff] }
 0x255   : > { %1303 = vrot.lane.b32.xlu0 %v2271_v17, %s2536_s11  ;;  %v4663_v17 = vld [vmem:[#allocation7_spill] sm:$0xff] }
 0x256   : > { %v1442_v26 = vpop.permute.xlu2 %1441  ;;  %v1178_v34 = vpop.permute.xlu1 %1177  ;;  %v1514_v28 = vsel %vm1505_vm0, %v2447_v38, %v4663_v17  ;;  %v2257_v38 = vld [vmem:[%s2618_s30 + $0x188] sm:$0xff] }
 0x257   : > { %v4009_v44 = vsel %vm1670_vm5, %v1650_v9, %v1178_v34  ;;  %v1176_v12 = vpop.permute.xlu0 %1175  ;;  %v1547_v21 = vsel %vm1538_vm1, %v1514_v28, %v4664_v37  ;;  %v2249_v34 = vld [vmem:[%s2618_s30 + $0x128] sm:$0xff] }
 0x258   : > { %v4012_v61 = vsel %vm1670_vm5, %v1649_v50, %v1176_v12  ;;  %v1580_v42 = vsel %vm1571_vm2, %v1547_v21, %v4665_v0  ;;  %v2272_v50 = vld [vmem:[%s2618_s30 + $0xc1] sm:$0xff]  ;;  %v4670_v21 = vld [vmem:[#allocation19_spill] sm:$0xff] }
 0x259   : > { %v1613_v56 = vsel %vm1604_vm3, %v1580_v42, %v4666_v4  ;;  %v2448_v37 = vld [vmem:[%s2618_s30 + $0x68] sm:$0xff]  ;;  %v4671_v42 = vld [vmem:[#allocation51_spill] sm:$0xff] }
 0x25a   : > { %v1646_v33 = vsel %vm1637_vm4, %v1613_v56, %v4667_v1  ;;  %v2313_v56 = vld [vmem:[%s2618_s30 + $0x12a] sm:$0xff]  ;;  %v4672_v1 = vld [vmem:[#allocation93_spill] sm:$0xff] }
 0x25b   : > { %v1679_v48 = vsel %vm1670_vm5, %v1646_v33, %v1170_v20  ;;  %v2264_v20 = vld [vmem:[%s2618_s30 + $0x61] sm:$0xff]  ;;  %v4673_v33 = vld [vmem:[#allocation108_spill] sm:$0xff] }
 0x25c   : > { %1321 = vrot.lane.b32.xlu2 %v2280_v54, %s2536_s11  ;;  %1431 = vrot.lane.b32.xlu1 %v2303_v25, %s2535_s10  ;;  %v1687_v25 = vsel %vm1670_vm5, %v3695_v36, %v3957_v46  ;;  %v1695_v36 = vsel %vm1670_vm5, %v3655_v29, %v3976_v40  ;;  %v2281_v40 = vld [vmem:[%s2618_s30 + $0x129] sm:$0xff] }
 0x25d   : > { %1415 = vrot.lane.b32.xlu0 %v2295_v7, %s2535_s10 }
 0x25e   : > { %v1298_v13 = vpop.permute.xlu2 %1297  ;;  %v1184_v32 = vpop.permute.xlu1 %1183 }
 0x25f   : > { %v4022_v14 = vsel %vm1670_vm5, %v4662_v41, %v1184_v32  ;;  %v1182_v6 = vpop.permute.xlu0 %1181  ;;  %v1712_v27 = vsel %vm1703_vm7, %v1679_v48, %v1298_v13  ;;  %v2304_v41 = vld [vmem:[%s2618_s30 + $0xc2] sm:$0xff]  ;;  %v4674_v48 = vld [vmem:[#allocation12_spill] sm:$0xff] }
 0x260   : > { %v4029_v62 = vsel %vm1670_vm5, %v3658_v11, %v1182_v6  ;;  %v4668_v11 = vld [vmem:[#allocation28_spill] sm:$0xff]  ;;  %v2296_v6 = vld [vmem:[%s2618_s30 + $0x62] sm:$0xff] }
 0x264   : > { %1465 = vrot.lane.b32.xlu2 %v4668_v11, %s2535_s10  ;;  %1449 = vrot.lane.b32.xlu1 %v2312_v55, %s2535_s10  ;;  %v1515_v55 = vsel %vm1505_vm0, %v2448_v37, %v4670_v21 }
 0x265   : > { %1337 = vrot.lane.b32.xlu0 %v4669_v18, %s2536_s11  ;;  %v1548_v4 = vsel %vm1538_vm1, %v1515_v55, %v4671_v42  ;;  %v2282_v42 = vld [vmem:[%s2618_s30 + $0x139] sm:$0xff] }
 0x266   : > { %v1426_v57 = vpop.permute.xlu2 %1425  ;;  %v4047_v45 = vpop.permute.xlu1 %1189  ;;  %v1581_v29 = vsel %vm1571_vm2, %v1548_v4, %v4672_v1  ;;  %v2305_v4 = vld [vmem:[%s2618_s30 + $0xca] sm:$0xff] }
 0x267   : > { %v1188_v59 = vpop.permute.xlu0 %1187  ;;  %v1745_v9 = vsel %vm1736_vm8, %v1712_v27, %v1426_v57  ;;  %v1614_v11 = vsel %vm1604_vm3, %v1581_v29, %v4673_v33  ;;  %v4675_v27 = vld [vmem:[#allocation98_spill] sm:$0xff]  ;;  %v2266_v33 = vld [vmem:[%s2618_s30 + $0x79] sm:$0xff] }
 0x268   : > { %2333 = vmatmul.msk.f32.vlgmr.msra.gmra.mxu1 %vm1778_vm9, %v1745_v9  ;;  %v1647_v18 = vsel %vm1637_vm4, %v1614_v11, %v4674_v48  ;;  %v2322_v11 = vld [vmem:[%s2618_s30 + $0x19a] sm:$0xff] }
 0x269   : > { %v1680_v57 = vsel %vm1670_vm5, %v1647_v18, %v3978_v24  ;;  %v2273_v24 = vld [vmem:[%s2618_s30 + $0xc9] sm:$0xff]  ;;  %v2314_v48 = vld [vmem:[%s2618_s30 + $0x13a] sm:$0xff] }
 0x26c   : > { %1195 = vrot.lane.b32.xlu2 %v2249_v34, %s2534_s9  ;;  %1305 = vrot.lane.b32.xlu1 %v2272_v50, %s2536_s11 }
 0x26d   : > { %1289 = vrot.lane.b32.xlu0 %v2264_v20, %s2536_s11 }
 0x26e   : > { %v1444_v12 = vpop.permute.xlu2 %1443  ;;  %v1330_v54 = vpop.permute.xlu1 %1329 }
 0x26f   : > { %v1314_v7 = vpop.permute.xlu0 %1313 }
 0x270   : > { %v1720_v13 = vsel %vm1703_vm7, %v1687_v25, %v1314_v7 }
 0x271   : > { %v1753_v32 = vsel %vm1736_vm8, %v1720_v13, %v1442_v26  ;;  %v1728_v26 = vsel %vm1703_vm7, %v1695_v36, %v1330_v54  ;;  %v2265_v13 = vld [vmem:[%s2618_s30 + $0x69] sm:$0xff] }
 0x272   : > { %2341 = vmatmul.msk.f32.vlgmr.msra.gmra.mxu2 %vm1778_vm9, %v1753_v32 }
 0x274   : > { %1433 = vrot.lane.b32.xlu2 %v2304_v41, %s2535_s10  ;;  %1417 = vrot.lane.b32.xlu1 %v2296_v6, %s2535_s10  ;;  %v1688_v6 = vsel %vm1670_vm5, %v3692_v10, %v1188_v59 }
 0x275   : > { %1211 = vrot.lane.b32.xlu0 %v2257_v38, %s2534_s9 }
 0x276   : > { %v1300_v46 = vpop.permute.xlu2 %1299  ;;  %v1282_v17 = vpop.permute.xlu1 %1281 }
 0x277   : > { %v1458_v28 = vpop.permute.xlu0 %1457  ;;  %v1713_v9 = vsel %vm1703_vm7, %v1680_v57, %v1300_v46  ;;  %v1704_v34 = vsel %vm1703_vm7, %v3895_v35, %v1282_v17  ;;  %v4676_v35 = vld [vmem:[#allocation23_spill] sm:$0xff] }
 0x278   : > { %v1761_v0 = vsel %vm1736_vm8, %v1728_v26, %v1458_v28  ;;  %v2297_v17 = vld [vmem:[%s2618_s30 + $0x6a] sm:$0xff]  ;;  %v2258_v26 = vld [vmem:[%s2618_s30 + $0x198] sm:$0xff] }
 0x279   : > { %2349 = vmatmul.msk.f32.vlgmr.msra.gmra.mxu3 %vm1778_vm9, %v1761_v0  ;;  %v2250_v28 = vld [vmem:[%s2618_s30 + $0x138] sm:$0xff] }
 0x27a   : > { %v2290_v0 = vld [vmem:[%s2618_s30 + $0x199] sm:$0xff] }
 0x27c   : > { %1451 = vrot.lane.b32.xlu2 %v2313_v56, %s2535_s10  ;;  %1339 = vrot.lane.b32.xlu1 %v4675_v27, %s2536_s11  ;;  %v4677_v27 = vld [vmem:[#allocation43_spill] sm:$0xff] }
 0x27d   : > { %1323 = vrot.lane.b32.xlu0 %v2281_v40, %s2536_s11  ;;  %v1689_v57 = vsel %vm1670_vm5, %v4677_v27, %v4047_v45 }
 0x27e   : > { %v1428_v50 = vpop.permute.xlu2 %1427  ;;  %v1410_v20 = vpop.permute.xlu1 %1409 }
 0x27f   : > { %v1204_v54 = vpop.permute.xlu0 %1203  ;;  %v1737_v25 = vsel %vm1736_vm8, %v1704_v34, %v1410_v20  ;;  %v1746_v7 = vsel %vm1736_vm8, %v1713_v9, %v1428_v50  ;;  %v2259_v20 = vld [vmem:[%s2618_s30 + $0x1a0] sm:$0xff] }
 0x280   : > { %2325 = vmatmul.msk.f32.vlgmr.msra.gmra.mxu0 %vm1778_vm9, %v1737_v25  ;;  %2334 = vmatmul.msk.f32.gmra.mxu1 %vm1778_vm9, %v1746_v7  ;;  %v1696_v10 = vsel %vm1670_vm5, %v3817_v53, %v1204_v54  ;;  %v2251_v54 = vld [vmem:[%s2618_s30 + $0x140] sm:$0xff] }
 0x281   : > { %v2274_v25 = vld [vmem:[%s2618_s30 + $0xd9] sm:$0xff] }
 0x284   : > { %1307 = vrot.lane.b32.xlu2 %v2273_v24, %s2536_s11  ;;  %1291 = vrot.lane.b32.xlu1 %v2265_v13, %s2536_s11 }
 0x285   : > { %1467 = vrot.lane.b32.xlu0 %v4676_v35, %s2535_s10 }
 0x286   : > { %v1446_v32 = vpop.permute.xlu2 %1445  ;;  %v1332_v41 = vpop.permute.xlu1 %1331 }
 0x287   : > { %v1316_v38 = vpop.permute.xlu0 %1315 }
 0x288   : > { %v1721_v36 = vsel %vm1703_vm7, %v1688_v6, %v1316_v38  ;;  %v2283_v38 = vld [vmem:[%s2618_s30 + $0x141] sm:$0xff] }
 0x289   : > { %v1754_v46 = vsel %vm1736_vm8, %v1721_v36, %v1444_v12  ;;  %v1729_v12 = vsel %vm1703_vm7, %v1696_v10, %v1332_v41  ;;  %v2298_v36 = vld [vmem:[%s2618_s30 + $0x7a] sm:$0xff] }
 0x28a   : > { %2342 = vmatmul.msk.f32.gmra.mxu2 %vm1778_vm9, %v1754_v46  ;;  %v2291_v10 = vld [vmem:[%s2618_s30 + $0x1a1] sm:$0xff] }
 0x28c   : > { %1419 = vrot.lane.b32.xlu2 %v2297_v17, %s2535_s10  ;;  %1213 = vrot.lane.b32.xlu1 %v2258_v26, %s2534_s9  ;;  %v2315_v26 = vld [vmem:[%s2618_s30 + $0x142] sm:$0xff] }
 0x28d   : > { %1197 = vrot.lane.b32.xlu0 %v2250_v28, %s2534_s9  ;;  %v2323_v28 = vld [vmem:[%s2618_s30 + $0x1a2] sm:$0xff] }
 0x28e   : > { %v4120_v59 = vpop.permute.xlu2 %1301  ;;  %v1284_v37 = vpop.permute.xlu1 %1283 }
 0x28f   : > { %v1460_v21 = vpop.permute.xlu0 %1459  ;;  %v1705_v53 = vsel %vm1703_vm7, %v3775_v15, %v1284_v37 }
 0x290   : > { %v1762_v55 = vsel %vm1736_vm8, %v1729_v12, %v1460_v21  ;;  %v1714_v12 = vsel %vm1703_vm7, %v3892_v60, %v4120_v59 }
 0x291   : > { %2350 = vmatmul.msk.f32.gmra.mxu3 %vm1778_vm9, %v1762_v55 }
 0x294   : > { %1341 = vrot.lane.b32.xlu2 %v2290_v0, %s2536_s11  ;;  %1325 = vrot.lane.b32.xlu1 %v2282_v42, %s2536_s11  ;;  %v2275_v0 = vld [vmem:[%s2618_s30 + $0xe1] sm:$0xff] }
 0x295   : > { %1435 = vrot.lane.b32.xlu0 %v2305_v4, %s2535_s10  ;;  %v2299_v42 = vld [vmem:[%s2618_s30 + $0x82] sm:$0xff] }
 0x296   : > { %v1414_v56 = vpop.permute.xlu2 %1413  ;;  %v1412_v1 = vpop.permute.xlu1 %1411 }
 0x297   : > { %v1206_v29 = vpop.permute.xlu0 %1205  ;;  %v1738_v40 = vsel %vm1736_vm8, %v1705_v53, %v1412_v1  ;;  %v2267_v53 = vld [vmem:[%s2618_s30 + $0x81] sm:$0xff] }
 0x298   : > { %2326 = vmatmul.msk.f32.gmra.mxu0 %vm1778_vm9, %v1738_v40  ;;  %v1697_v45 = vsel %vm1670_vm5, %v3813_v31, %v1206_v29  ;;  %v2306_v31 = vld [vmem:[%s2618_s30 + $0xda] sm:$0xff] }
 0x29c   : > { %1293 = vrot.lane.b32.xlu2 %v2266_v33, %s2536_s11  ;;  %1469 = vrot.lane.b32.xlu1 %v2322_v11, %s2535_s10 }
 0x29d   : > { %1453 = vrot.lane.b32.xlu0 %v2314_v48, %s2535_s10 }
 0x29e   : > { %v1336_v15 = vpop.permute.xlu2 %1335  ;;  %v1334_v18 = vpop.permute.xlu1 %1333 }
 0x29f   : > { %v1318_v9 = vpop.permute.xlu0 %1317  ;;  %v1730_v13 = vsel %vm1703_vm7, %v1697_v45, %v1334_v18 }
 0x2a0   : > { %v1722_v34 = vsel %vm1703_vm7, %v1689_v57, %v1318_v9 }
 0x2a1   : > { %v1755_v50 = vsel %vm1736_vm8, %v1722_v34, %v1446_v32 }
 0x2a2   : > { %2343 = vmatmul.msk.f32.gmra.mxu2 %vm1778_vm9, %v1755_v50 }
 0x2a4   : > { %1215 = vrot.lane.b32.xlu2 %v2259_v20, %s2534_s9  ;;  %1199 = vrot.lane.b32.xlu1 %v2251_v54, %s2534_s9 }
 0x2a5   : > { %1309 = vrot.lane.b32.xlu0 %v2274_v25, %s2536_s11 }
 0x2a6   : > { %v1288_v7 = vpop.permute.xlu2 %1287  ;;  %v1286_v24 = vpop.permute.xlu1 %1285 }
 0x2a7   : > { %v1706_v35 = vsel %vm1703_vm7, %v3920_v3, %v1286_v24  ;;  %v1462_v32 = vpop.permute.xlu0 %1461  ;;  %v1707_v9 = vsel %vm1703_vm7, %v3913_v49, %v1288_v7 }
 0x2a8   : > { %v1763_v41 = vsel %vm1736_vm8, %v1730_v13, %v1462_v32  ;;  %v1739_v6 = vsel %vm1736_vm8, %v1706_v35, %v1414_v56 }
 0x2a9   : > { %2351 = vmatmul.msk.f32.gmra.mxu3 %vm1778_vm9, %v1763_v41  ;;  %2327 = vmatmul.msk.f32.gmra.mxu0 %vm1778_vm9, %v1739_v6 }
 0x2ac   : > { %1437 = vrot.lane.b32.xlu1 %v2306_v31, %s2535_s10  ;;  %1327 = vrot.lane.b32.xlu2 %v2283_v38, %s2536_s11  ;;  %v4225_v31 = vld [vmem:[%s4393_s2] ss:$0 sm:$0xff] }
 0x2ad   : > { %1421 = vrot.lane.b32.xlu0 %v2298_v36, %s2535_s10 }
 0x2ae   : > { %v1208_v3 = vpop.permute.xlu1 %1207  ;;  %v1210_v17 = vpop.permute.xlu2 %1209 }
 0x2af   : > { %v1192_v46 = vpop.permute.xlu0 %1191  ;;  %v1698_v56 = vsel %vm1670_vm5, %v3689_v23, %v1208_v3  ;;  %v2307_v23 = vld [vmem:[%s2618_s30 + $0xe2] sm:$0xff]  ;;  %v1699_v49 = vsel %vm1670_vm5, %v3862_v58, %v1210_v17  ;;  %s175_s30 = sand.u32 1, %s2511_s13  }
 0x2b0   : > { %v1690_v60 = vsel %vm1670_vm5, %v3738_v19, %v1192_v46  ;;  %v1731_v1 = vsel %vm1703_vm7, %v1698_v56, %v1336_v15  ;;  %s2130_s7 = sshll.u32 %s175_s30, 8 }
 0x2b4   : > { %1455 = vrot.lane.b32.xlu1 %v2315_v26, %s2535_s10  ;;  %1471 = vrot.lane.b32.xlu2 %v2323_v28, %s2535_s10 }
 0x2b5   : > { %1343 = vrot.lane.b32.xlu0 %v2291_v10, %s2536_s11 }
 0x2b6   : > { %v1320_v37 = vpop.permute.xlu1 %1319  ;;  %v1322_v4 = vpop.permute.xlu2 %1321 }
 0x2b7   : > { %v1430_v21 = vpop.permute.xlu0 %1429  ;;  %v1723_v29 = vsel %vm1703_vm7, %v1690_v60, %v1320_v37 }
 0x2b8   : > { %v1747_v55 = vsel %vm1736_vm8, %v1714_v12, %v1430_v21 }
 0x2b9   : > { %2335 = vmatmul.msk.f32.gmra.mxu1 %vm1778_vm9, %v1747_v55 }
 0x2bc   : > { %1311 = vrot.lane.b32.xlu1 %v2275_v0, %s2536_s11  ;;  %1423 = vrot.lane.b32.xlu2 %v2299_v42, %s2535_s10 }
 0x2bd   : > { %1295 = vrot.lane.b32.xlu0 %v2267_v53, %s2536_s11  ;;  %s2362_s11 = sshll.u32 %s2519_s15, 8  ;;  %s2025_s15 = scalar_lea.sflag [#allocation3], %s175_s30 }
 0x2be   : > { %v1464_v59 = vpop.permute.xlu1 %1463  ;;  %v1466_v48 = vpop.permute.xlu2 %1465  ;;  %s2038_s21 = scalar_lea.hbm %s4394_s3, %s2362_s11 }
 0x2bf   : > { %v1448_v40 = vpop.permute.xlu0 %1447  ;;  %v1764_v33 = vsel %vm1736_vm8, %v1731_v1, %v1464_v59  ;;  %s2041_s26 = sshll.u32 %s2038_s21, 4  ;;  %s2042_s26 = int_to_ptr.hbm [resolvable:$true] %s2041_s26 }
 0x2c0   : > { %v1756_v11 = vsel %vm1736_vm8, %v1723_v29, %v1448_v40  ;;  %2352 = vmatmul.msk.f32.gmra.mxu3 %vm1778_vm9, %v1764_v33  ;;  %s2463_s27 = sshra.s32 %s2042_s26, 4  ;;  %s2464_s27 = int_to_ptr.hbm [resolvable:$true] %s2463_s27 }
 0x2c1   : > { %2344 = vmatmul.msk.f32.gmra.mxu2 %vm1778_vm9, %v1756_v11  ;;  %s2465_s28 = scalar_lea.hbm %s2464_s27, 256  ;;  %p2470_p1 = scmp.lt.s32.totalorder %s2464_s27, %s4394_s3 }
 0x2c2   : > { %p2466_p12 = scmp.ne.s32.totalorder %s2464_s27, %s2465_s28  ;;  %p2471_p2 = scmp.lt.s32.totalorder %s2469_s6, %s2465_s28 }
 0x2c4   : > { %p2467_p13 = pnand %p2466_p12, %p2598_p4  ;;  %p2472_p3 = por %p2471_p2, %p2470_p1 }
 0x2c5   : > { %1439 = vrot.lane.b32.xlu0 %v2307_v23, %s2535_s10  ;;  %s4231_s10 = scalar_lea.vmem [#allocation2], %s2130_s7 }
 0x2c6   : > { %v1194_v18 = vpop.permute.xlu1 %1193  ;;  %v1196_v27 = vpop.permute.xlu2 %1195  ;;  %s2039_s23 = sshll.u32 %s4231_s10, 4  ;;  %p2468_p0 = pneg %p2467_p13  ;;  %s2040_s23 = int_to_ptr.vmem [resolvable:$true] %s2039_s23 }
 0x2c7   : > { %v1304_v19 = vpop.permute.xlu0 %1303  ;;  %v1691_v54 = vsel %vm1670_vm5, %v3735_v16, %v1194_v18  ;;  %v1692_v10 = vsel %vm1670_vm5, %v3625_v2, %v1196_v27 }
 0x2c8   : > { %v1715_v15 = vsel %vm1703_vm7, %v4012_v61, %v1304_v19  ;;  %v1724_v61 = vsel %vm1703_vm7, %v1691_v54, %v1322_v4  ;;  %p2473_p5 = pnand %p2472_p3, %p2468_p0 }
 0x2ce   : > { %v1432_v57 = vpop.permute.xlu1 %1431  ;;  %v1434_v24 = vpop.permute.xlu2 %1433 }
 0x2cf   : > { %v1416_v34 = vpop.permute.xlu0 %1415  ;;  %v1748_v50 = vsel %vm1736_vm8, %v1715_v15, %v1432_v57 }
 0x2d0   : > { %v1740_v20 = vsel %vm1736_vm8, %v1707_v9, %v1416_v34  ;;  %2336 = vmatmul.msk.f32.gmra.mxu1 %vm1778_vm9, %v1748_v50 }
 0x2d1   : > { %2328 = vmatmul.msk.f32.gmra.mxu0 %vm1778_vm9, %v1740_v20 }
 0x2d6   : > { %v1450_v25 = vpop.permute.xlu1 %1449  ;;  %v1452_v6 = vpop.permute.xlu2 %1451 }
 0x2d7   : > { %v1338_v45 = vpop.permute.xlu0 %1337  ;;  %v1757_v7 = vsel %vm1736_vm8, %v1724_v61, %v1450_v25 }
 0x2d8   : > { %v1732_v13 = vsel %vm1703_vm7, %v1699_v49, %v1338_v45  ;;  %2345 = vmatmul.msk.f32.gmra.mxu2 %vm1778_vm9, %v1757_v7 }
 0x2d9   : > { %v1765_v35 = vsel %vm1736_vm8, %v1732_v13, %v1466_v48 }
 0x2da   : > { %2353 = vmatmul.msk.f32.gmra.mxu3 %vm1778_vm9, %v1765_v35 }
 0x2de   : > { %v1306_v16 = vpop.permute.xlu1 %1305  ;;  %v1308_v26 = vpop.permute.xlu2 %1307 }
 0x2df   : > { %v1716_v32 = vsel %vm1703_vm7, %v4009_v44, %v1306_v16  ;;  %v1290_v41 = vpop.permute.xlu0 %1289  ;;  %v1717_v19 = vsel %vm1703_vm7, %v3909_v8, %v1308_v26 }
 0x2e0   : > { %v1749_v58 = vsel %vm1736_vm8, %v1716_v32, %v1434_v24  ;;  %v1708_v36 = vsel %vm1703_vm7, %v3810_v39, %v1290_v41 }
 0x2e1   : > { %2337 = vmatmul.msk.f32.gmra.mxu1 %vm1778_vm9, %v1749_v58 }
 0x2e5   : > { %v1920_v38 = vpop.f32.mrf.mxu1 }
 0x2e6   : > { %v1921_v44 = vadd.f32 %v4225_v31, %v1920_v38  ;;  %v1418_v3 = vpop.permute.xlu1 %1417  ;;  %v1420_v55 = vpop.permute.xlu2 %1419 }
 0x2e7   : > { %v1212_v46 = vpop.permute.xlu0 %1211  ;;  %v1741_v17 = vsel %vm1736_vm8, %v1708_v36, %v1418_v3 }
 0x2e8   : > { %2000 = vst [vmem:[%s4231_s10 + $0x40] sm:$0xff] %v1921_v44  ;;  %2329 = vmatmul.msk.f32.gmra.mxu0 %vm1778_vm9, %v1741_v17  ;;  %v1700_v0 = vsel %vm1670_vm5, %v3859_v5, %v1212_v46 }
 0x2ee   : > { %v1340_v28 = vpop.permute.xlu1 %1339  ;;  %v1342_v48 = vpop.permute.xlu2 %1341 }
 0x2ef   : > { %v1324_v37 = vpop.permute.xlu0 %1323  ;;  %v1733_v53 = vsel %vm1703_vm7, %v1700_v0, %v1340_v28 }
 0x2f0   : > { %v1725_v39 = vsel %vm1703_vm7, %v1692_v10, %v1324_v37 }
 0x2f1   : > { %v1758_v12 = vsel %vm1736_vm8, %v1725_v39, %v1452_v6 }
 0x2f2   : > { %2346 = vmatmul.msk.f32.gmra.mxu2 %vm1778_vm9, %v1758_v12 }
 0x2f5   : > { %v1944_v21 = vpop.f32.mrf.mxu2 }
 0x2f6   : > { %v1945_v42 = vadd.f32 %v4225_v31, %v1944_v21  ;;  %v1292_v4 = vpop.permute.xlu1 %1291  ;;  %v1294_v57 = vpop.permute.xlu2 %1293 }
 0x2f7   : > { %v1709_v2 = vsel %vm1703_vm7, %v3968_v30, %v1292_v4  ;;  %v1468_v56 = vpop.permute.xlu0 %1467  ;;  %v1710_v6 = vsel %vm1703_vm7, %v3962_v63, %v1294_v57 }
 0x2f8   : > { %2008 = vst [vmem:[%s4231_s10 + $0x80] sm:$0xff] %v1945_v42  ;;  %v1766_v60 = vsel %vm1736_vm8, %v1733_v53, %v1468_v56  ;;  %v1742_v59 = vsel %vm1736_vm8, %v1709_v2, %v1420_v55 }
 0x2f9   : > { %2354 = vmatmul.msk.f32.gmra.mxu3 %vm1778_vm9, %v1766_v60  ;;  %2330 = vmatmul.msk.f32.gmra.mxu0 %vm1778_vm9, %v1742_v59 }
 0x2fc   : > { %v1968_v5 = vpop.f32.mrf.mxu3 }
 0x2fd   : > { %v1969_v1 = vadd.f32 %v4225_v31, %v1968_v5  ;;  %v1896_v29 = vpop.f32.mrf.mxu0  ;;  %v1923_v40 = vpop.f32.mrf.mxu1 }
 0x2fe   : > { %v1897_v33 = vadd.f32 %v4225_v31, %v1896_v29  ;;  %v1924_v30 = vadd.f32 %v4225_v31, %v1923_v40  ;;  %v1214_v11 = vpop.permute.xlu1 %1213 }
 0x2ff   : > { %2016 = vst [vmem:[%s4231_s10 + $0xc0] sm:$0xff] %v1969_v1  ;;  %v1198_v23 = vpop.permute.xlu0 %1197  ;;  %v1701_v9 = vsel %vm1670_vm5, %v3732_v43, %v1214_v11  ;;  %v1216_v43 = vpop.permute.xlu2 %1215 }
 0x300   : > { %1992 = vst [vmem:[%s4231_s10] sm:$0xff] %v1897_v33  ;;  %v1693_v50 = vsel %vm1670_vm5, %v3781_v22, %v1198_v23  ;;  %v1734_v25 = vsel %vm1703_vm7, %v1701_v9, %v1342_v48  ;;  %v1702_v10 = vsel %vm1670_vm5, %v3899_v52, %v1216_v43 }
 0x301   : > { %2001 = vst [vmem:[%s4231_s10 + $0x48] sm:$0xff] %v1924_v30 }
 0x306   : > { %v1326_v18 = vpop.permute.xlu1 %1325 }
 0x307   : > { %v1436_v27 = vpop.permute.xlu0 %1435  ;;  %v1726_v8 = vsel %vm1703_vm7, %v1693_v50, %v1326_v18  ;;  %v1328_v32 = vpop.permute.xlu2 %1327 }
 0x308   : > { %v1750_v15 = vsel %vm1736_vm8, %v1717_v19, %v1436_v27 }
 0x309   : > { %2338 = vmatmul.msk.f32.gmra.mxu1 %vm1778_vm9, %v1750_v15 }
 0x30d   : > { %v1947_v34 = vpop.f32.mrf.mxu2 }
 0x30e   : > { %v1948_v20 = vadd.f32 %v4225_v31, %v1947_v34  ;;  %v1470_v54 = vpop.permute.xlu1 %1469 }
 0x30f   : > { %v1454_v61 = vpop.permute.xlu0 %1453  ;;  %v1767_v49 = vsel %vm1736_vm8, %v1734_v25, %v1470_v54  ;;  %v1472_v46 = vpop.permute.xlu2 %1471 }
 0x310   : > { %2009 = vst [vmem:[%s4231_s10 + $0x88] sm:$0xff] %v1948_v20  ;;  %v1759_v45 = vsel %vm1736_vm8, %v1726_v8, %v1454_v61  ;;  %2355 = vmatmul.msk.f32.gmra.mxu3 %vm1778_vm9, %v1767_v49 }
 0x311   : > { %2347 = vmatmul.msk.f32.gmra.mxu2 %vm1778_vm9, %v1759_v45 }
 0x314   : > { %v1971_v22 = vpop.f32.mrf.mxu3 }
 0x315   : > { %v1972_v7 = vadd.f32 %v4225_v31, %v1971_v22  ;;  %v1899_v24 = vpop.f32.mrf.mxu0 }
 0x316   : > { %v1900_v13 = vadd.f32 %v4225_v31, %v1899_v24  ;;  %v1200_v35 = vpop.permute.xlu1 %1199 }
 0x317   : > { %2017 = vst [vmem:[%s4231_s10 + $0xc8] sm:$0xff] %v1972_v7  ;;  %v1310_v16 = vpop.permute.xlu0 %1309  ;;  %v1694_v3 = vsel %vm1670_vm5, %v3778_v47, %v1200_v35  ;;  %v1424_v52 = vpop.permute.xlu2 %1423 }
 0x318   : > { %1993 = vst [vmem:[%s4231_s10 + $0x8] sm:$0xff] %v1900_v13  ;;  %v1718_v41 = vsel %vm1703_vm7, %v4029_v62, %v1310_v16  ;;  %v1727_v17 = vsel %vm1703_vm7, %v1694_v3, %v1328_v32 }
 0x31e   : > { %v1438_v58 = vpop.permute.xlu1 %1437 }
 0x31f   : > { %v1422_v38 = vpop.permute.xlu0 %1421  ;;  %v1751_v36 = vsel %vm1736_vm8, %v1718_v41, %v1438_v58 }
 0x320   : > { %v1743_v44 = vsel %vm1736_vm8, %v1710_v6, %v1422_v38  ;;  %2339 = vmatmul.msk.f32.gmra.mxu1 %vm1778_vm9, %v1751_v36 }
 0x321   : > { %2331 = vmatmul.msk.f32.gmra.mxu0 %vm1778_vm9, %v1743_v44 }
 0x325   : > { %v1950_v62 = vpop.f32.mrf.mxu2 }
 0x326   : > { %v1951_v63 = vadd.f32 %v4225_v31, %v1950_v62  ;;  %v1456_v26 = vpop.permute.xlu1 %1455  ;;  %v1902_v28 = vpop.f32.mrf.mxu0 }
 0x327   : > { %v1344_v37 = vpop.permute.xlu0 %1343  ;;  %v1903_v39 = vadd.f32 %v4225_v31, %v1902_v28  ;;  %v1760_v12 = vsel %vm1736_vm8, %v1727_v17, %v1456_v26 }
 0x328   : > { %2010 = vst [vmem:[%s4231_s10 + $0x90] sm:$0xff] %v1951_v63  ;;  %v1735_v47 = vsel %vm1703_vm7, %v1702_v10, %v1344_v37  ;;  %2348 = vmatmul.msk.f32.gmra.mxu2 %vm1778_vm9, %v1760_v12 }
 0x329   : > { %1994 = vst [vmem:[%s4231_s10 + $0x10] sm:$0xff] %v1903_v39  ;;  %v1768_v21 = vsel %vm1736_vm8, %v1735_v47, %v1472_v46 }
 0x32a   : > { %2356 = vmatmul.msk.f32.gmra.mxu3 %vm1778_vm9, %v1768_v21 }
 0x32c   : > { %v1974_v55 = vpop.f32.mrf.mxu3 }
 0x32d   : > { %v1975_v0 = vadd.f32 %v4225_v31, %v1974_v55 }
 0x32e   : > { %v1312_v2 = vpop.permute.xlu1 %1311 }
 0x32f   : > { %2018 = vst [vmem:[%s4231_s10 + $0xd0] sm:$0xff] %v1975_v0  ;;  %v1296_v42 = vpop.permute.xlu0 %1295  ;;  %v1719_v60 = vsel %vm1703_vm7, %v4022_v14, %v1312_v2 }
 0x330   : > { %v1711_v4 = vsel %vm1703_vm7, %v3856_v51, %v1296_v42 }
 0x331   : > { %v1744_v53 = vsel %vm1736_vm8, %v1711_v4, %v1424_v52 }
 0x332   : > { %2332 = vmatmul.msk.f32.gmra.mxu0 %vm1778_vm9, %v1744_v53 }
 0x336   : > { %v1926_v56 = vpop.f32.mrf.mxu1 }
 0x337   : > { %v1927_v59 = vadd.f32 %v4225_v31, %v1926_v56  ;;  %v1440_v5 = vpop.permute.xlu0 %1439 }
 0x338   : > { %v1752_v1 = vsel %vm1736_vm8, %v1719_v60, %v1440_v5 }
 0x339   : > { %2002 = vst [vmem:[%s4231_s10 + $0x50] sm:$0xff] %v1927_v59  ;;  %2340 = vmatmul.msk.f32.gmra.mxu1 %vm1778_vm9, %v1752_v1 }
 0x343   : > { %v1977_v51 = vpop.f32.mrf.mxu3 }
 0x344   : > { %v1953_v29 = vpop.f32.mrf.mxu2  ;;  %v1978_v40 = vadd.f32 %v4225_v31, %v1977_v51 }
 0x345   : > { %v1954_v33 = vadd.f32 %v4225_v31, %v1953_v29 }
 0x346   : > { %2019 = vst [vmem:[%s4231_s10 + $0xd8] sm:$0xff] %v1978_v40 }
 0x347   : > { %2011 = vst [vmem:[%s4231_s10 + $0x98] sm:$0xff] %v1954_v33 }
 0x34d   : > { %v1929_v14 = vpop.f32.mrf.mxu1 }
 0x34e   : > { %v1905_v30 = vpop.f32.mrf.mxu0  ;;  %v1930_v11 = vadd.f32 %v4225_v31, %v1929_v14 }
 0x34f   : > { %v1906_v23 = vadd.f32 %v4225_v31, %v1905_v30 }
 0x350   : > { %2003 = vst [vmem:[%s4231_s10 + $0x58] sm:$0xff] %v1930_v11 }
 0x351   : > { %1995 = vst [vmem:[%s4231_s10 + $0x18] sm:$0xff] %v1906_v23 }
 0x35b   : > { %v1956_v48 = vpop.f32.mrf.mxu2 }
 0x35c   : > { %v1957_v18 = vadd.f32 %v4225_v31, %v1956_v48 }
 0x35d   : > { %v1980_v19 = vpop.f32.mrf.mxu3 }
 0x35e   : > { %2012 = vst [vmem:[%s4231_s10 + $0xa0] sm:$0xff] %v1957_v18  ;;  %v1981_v27 = vadd.f32 %v4225_v31, %v1980_v19  ;;  %v1932_v15 = vpop.f32.mrf.mxu1 }
 0x35f   : > { %v1933_v57 = vadd.f32 %v4225_v31, %v1932_v15 }
 0x360   : > { %2020 = vst [vmem:[%s4231_s10 + $0xe0] sm:$0xff] %v1981_v27 }
 0x361   : > { %2004 = vst [vmem:[%s4231_s10 + $0x60] sm:$0xff] %v1933_v57 }
 0x365   : > { %v1908_v9 = vpop.f32.mrf.mxu0 }
 0x366   : > { %v1909_v34 = vadd.f32 %v4225_v31, %v1908_v9 }
 0x368   : > { %1996 = vst [vmem:[%s4231_s10 + $0x20] sm:$0xff] %v1909_v34 }
 0x375   : > { %v1959_v50 = vpop.f32.mrf.mxu2 }
 0x376   : > { %v1960_v20 = vadd.f32 %v4225_v31, %v1959_v50  ;;  %v1911_v54 = vpop.f32.mrf.mxu0 }
 0x377   : > { %v1912_v25 = vadd.f32 %v4225_v31, %v1911_v54 }
 0x378   : > { %2013 = vst [vmem:[%s4231_s10 + $0xa8] sm:$0xff] %v1960_v20 }
 0x379   : > { %1997 = vst [vmem:[%s4231_s10 + $0x28] sm:$0xff] %v1912_v25 }
 0x37c   : > { %v1983_v8 = vpop.f32.mrf.mxu3 }
 0x37d   : > { %v1984_v61 = vadd.f32 %v4225_v31, %v1983_v8 }
 0x37f   : > { %2021 = vst [vmem:[%s4231_s10 + $0xe8] sm:$0xff] %v1984_v61 }
 0x386   : > { %v1935_v49 = vpop.f32.mrf.mxu1 }
 0x387   : > { %v1936_v45 = vadd.f32 %v4225_v31, %v1935_v49 }
 0x389   : > { %2005 = vst [vmem:[%s4231_s10 + $0x68] sm:$0xff] %v1936_v45 }
 0x393   : > { %v1986_v43 = vpop.f32.mrf.mxu3 }
 0x394   : > { %v1962_v22 = vpop.f32.mrf.mxu2  ;;  %v1987_v7 = vadd.f32 %v4225_v31, %v1986_v43 }
 0x395   : > { %v1963_v24 = vadd.f32 %v4225_v31, %v1962_v22 }
 0x396   : > { %2022 = vst [vmem:[%s4231_s10 + $0xf0] sm:$0xff] %v1987_v7 }
 0x397   : > { %2014 = vst [vmem:[%s4231_s10 + $0xb0] sm:$0xff] %v1963_v24 }
 0x39d   : > { %v1938_v13 = vpop.f32.mrf.mxu1 }
 0x39e   : > { %v1914_v35 = vpop.f32.mrf.mxu0  ;;  %v1939_v16 = vadd.f32 %v4225_v31, %v1938_v13 }
 0x39f   : > { %v1915_v32 = vadd.f32 %v4225_v31, %v1914_v35 }
 0x3a0   : > { %2006 = vst [vmem:[%s4231_s10 + $0x70] sm:$0xff] %v1939_v16 }
 0x3a1   : > { %1998 = vst [vmem:[%s4231_s10 + $0x30] sm:$0xff] %v1915_v32 }
 0x3ab   : > { %v1965_v41 = vpop.f32.mrf.mxu2 }
 0x3ac   : > { %v1966_v58 = vadd.f32 %v4225_v31, %v1965_v41 }
 0x3ad   : > { %v1989_v6 = vpop.f32.mrf.mxu3 }
 0x3ae   : > { %2015 = vst [vmem:[%s4231_s10 + $0xb8] sm:$0xff] %v1966_v58  ;;  %v1990_v38 = vadd.f32 %v4225_v31, %v1989_v6 }
 0x3af   : > { %v1917_v36 = vpop.f32.mrf.mxu0 }
 0x3b0   : > { %2023 = vst [vmem:[%s4231_s10 + $0xf8] sm:$0xff] %v1990_v38  ;;  %v1918_v44 = vadd.f32 %v4225_v31, %v1917_v36 }
 0x3b2   : > { %1999 = vst [vmem:[%s4231_s10 + $0x38] sm:$0xff] %v1918_v44 }
 0x3b6   : > { %v1941_v3 = vpop.f32.mrf.mxu1 }
 0x3b7   : > { %v1942_v46 = vadd.f32 %v4225_v31, %v1941_v3 }
 0x3b9   : > { %2007 = vst [vmem:[%s4231_s10 + $0x78] sm:$0xff] %v1942_v46 }
 0x3ba   : > { %2476 = shalt.err (!%p2473_p5)
}
 0x3bb   : > { %s2537_s30 = smov 128  }
 0x3bc   : > { %2379 = dma.vmem_to_hbm [thread:$0]  (%p2598_p4), %s2040_s23, 4096, %s2042_s26, %s2025_s15, %s2537_s30, %s2537_s30, %s2530_s5  }
 0x3bd PF: > { %p2385_p6 = scmp.ge.s32.totalorder %s2527_s17, 2  ;;  %s2056_s9 = sand.u32 1, %s2507_s12  }
 0x3be   : > { %s2057_s10 = scalar_lea.sflag [#allocation3], %s2056_s9 }
 0x3bf   : > { %p2382_p7 = pnand %p2385_p6, %p2605_p8 }
 0x3c1   : > { %p2383_p9 = pneg %p2382_p7 }
 0x3c3   : > { %2502 = dma.done.wait (%p2383_p9), %s2057_s10, 4096  }
 0x3c4   : > { %2504 = vsyncadd (%p2383_p9), %s2057_s10, 4294963200  ;;  %s16_s17 = sadd.s32 1, %s2527_s17   ;;  %s4678_s12 = smov %s2511_s13 }
 0x3c5   : > { %p13_p10 = scmp.ge.s32.totalorder %s16_s17, 4   ;;  %s4679_s13 = smov %s2515_s14 }
 0x3c6   : > { %s4680_s14 = smov %s2611_s25  ;;  %s4681_s15 = smov %s2523_s16 }
 0x3c7   : > { %s4682_s16 = smov %s4684_s20  ;;  %15 = sbr.rel (!%p13_p10) target bundleno = 4 (0x4), region = 70 }
 0x3cc   :  { %2063 = vsyncpa [#allocation3], 1 }
 0x3cd   :  { %2065 = vsyncpa [#allocation3 + $0x1], 1 }

</bundles_post_ra>
